<compile_context>
chip_gen: v7x
topology: tpu7x:2x2x1
jax: 0.10.0
libtpu: 0.0.40
codegen_flags: <defaults>
</compile_context>

<pallas_src>
import functools
import math

import jax
import jax.numpy as jnp
from jax import lax
from jax.experimental import pallas as pl
from jax.experimental.pallas import tpu as pltpu


def _round_up(x, m):
    return ((x + m - 1) // m) * m


# tanh-form GELU (EUP tanh; ~1e-3 from PyTorch's exact erf nn.GELU()).
_SQRT_2_OVER_PI = 0.7978845608028654


def _gelu(x):
    return 0.5 * x * (1.0 + jnp.tanh(_SQRT_2_OVER_PI * (x + 0.044715 * x * x * x)))


# ---------------------------------------------------------------------------
# Tiled matmul + bias: grid (M/tm, N/tn, K/tk), f32 VMEM accumulator, bf16 MXU
# operands. Used for the hoisted gate precompute and the vocab projection.
# ---------------------------------------------------------------------------
def _matmul_bias_kernel(x_ref, w_ref, b_ref, o_ref, acc_ref):
    @pl.when(pl.program_id(2) == 0)
    def _():
        acc_ref[...] = jnp.zeros_like(acc_ref)

    acc_ref[...] += jnp.dot(x_ref[...], w_ref[...],
                            preferred_element_type=jnp.float32)

    @pl.when(pl.program_id(2) == pl.num_programs(2) - 1)
    def _():
        o_ref[...] = acc_ref[...] + b_ref[...]


def matmul_bias(x, w, b, *, tm=256, tn=256, tk=512):
    """(M,K) @ (K,N) + b, f32 in/out, bf16 MXU operands, f32 accumulation."""
    M, K = x.shape
    _, N = w.shape
    tm = min(tm, _round_up(M, 8))
    tn = min(tn, _round_up(N, 128))
    tk = min(tk, _round_up(K, 128))
    Mp, Np, Kp = _round_up(M, tm), _round_up(N, tn), _round_up(K, tk)

    xp = jnp.pad(x, ((0, Mp - M), (0, Kp - K))).astype(jnp.bfloat16)
    wp = jnp.pad(w, ((0, Kp - K), (0, Np - N))).astype(jnp.bfloat16)
    bp = jnp.pad(b.reshape(-1), (0, Np - N)).reshape(1, Np).astype(jnp.float32)

    out = pl.pallas_call(
        _matmul_bias_kernel,
        out_shape=jax.ShapeDtypeStruct((Mp, Np), jnp.float32),
        grid_spec=pltpu.PrefetchScalarGridSpec(
            num_scalar_prefetch=0,
            grid=(Mp // tm, Np // tn, Kp // tk),
            in_specs=[pl.BlockSpec((tm, tk), lambda i, j, k: (i, k)),
                      pl.BlockSpec((tk, tn), lambda i, j, k: (k, j)),
                      pl.BlockSpec((1, tn), lambda i, j, k: (0, j))],
            out_specs=pl.BlockSpec((tm, tn), lambda i, j, k: (i, j)),
            scratch_shapes=[pltpu.VMEM((tm, tn), jnp.float32)]),
        compiler_params=pltpu.CompilerParams(
            dimension_semantics=("parallel", "parallel", "arbitrary")),
    )(xp, wp, bp)
    return out[:M, :N]


# ---------------------------------------------------------------------------
# sLSTM recurrence: one grid step per time CHUNK; the input projection is already
# folded into gx (= x @ Wx + b). Only h @ Wh runs inside the time loop.
# State (h, c, n, m) is carried through the fori_loop and persisted in VMEM scratch
# across chunks.
# ---------------------------------------------------------------------------
def _make_slstm_kernel(t_actual, tc, hp):
    def kernel(gx_ref, wh_ref, hseq_ref, cfin_ref, h_sc, c_sc, n_sc, m_sc):
        chunk = pl.program_id(0)

        @pl.when(chunk == 0)
        def _():
            h_sc[...] = jnp.zeros_like(h_sc)
            c_sc[...] = jnp.zeros_like(c_sc)
            n_sc[...] = jnp.zeros_like(n_sc)
            m_sc[...] = jnp.zeros_like(m_sc)

        wh = wh_ref[...]                                   # (Hp, 4Hp) bf16, loop-invariant

        def step(i, carry):
            h, c, n, m = carry
            gates = gx_ref[i] + jnp.dot(h.astype(jnp.bfloat16), wh,
                                        preferred_element_type=jnp.float32)
            i_pre = gates[:, 0 * hp:1 * hp]                # 128-lane aligned slices
            f_pre = gates[:, 1 * hp:2 * hp]
            z_pre = gates[:, 2 * hp:3 * hp]
            o_pre = gates[:, 3 * hp:4 * hp]

            z = jnp.tanh(z_pre)
            o = jax.nn.sigmoid(o_pre)
            m_new = jnp.maximum(f_pre + m, i_pre)          # stabilizer for exp gates
            i_g = jnp.exp(i_pre - m_new)
            f_g = jnp.exp(f_pre + m - m_new)
            c_new = f_g * c + i_g * z
            n_new = f_g * n + i_g
            # guarded normalizer (avoids 0/0 at early steps) + EUP approx reciprocal
            h_new = o * c_new * pl.reciprocal(jnp.maximum(n_new, 1e-6), approx=True)

            hseq_ref[i] = h_new

            valid = (chunk * tc + i) < t_actual            # freeze state on padded steps
            h = jnp.where(valid, h_new, h)
            c = jnp.where(valid, c_new, c)
            n = jnp.where(valid, n_new, n)
            m = jnp.where(valid, m_new, m)
            return (h, c, n, m)

        h, c, n, m = lax.fori_loop(
            0, tc, step, (h_sc[...], c_sc[...], n_sc[...], m_sc[...]), unroll=True)
        h_sc[...] = h
        c_sc[...] = c
        n_sc[...] = n
        m_sc[...] = m
        cfin_ref[...] = c                                  # written every chunk (cheap, safe)

    return kernel


def slstm_layer(x_tbd, wx, wh, b, *, tc=16):
    """x_tbd: (T, B, Din) f32; wx: (Din, 4H); wh: (H, 4H); b: (4H,).
    Returns h_seq (T, B, H) f32 and final cell state c_fin (B, H) f32."""
    T, B, Din = x_tbd.shape
    H = wh.shape[0]
    Hp = _round_up(H, 128)        # lane alignment: each gate slice starts on a lane tile
    Bp = _round_up(B, 8)          # sublane alignment
    TC = min(tc, T)
    Tp = _round_up(T, TC)

    def pad_gate_cols(w):         # (..., 4H) -> (..., 4Hp), zero-pad each gate separately
        w4 = w.reshape(w.shape[:-1] + (4, H))
        pad = [(0, 0)] * (w4.ndim - 1) + [(0, Hp - H)]
        return jnp.pad(w4, pad).reshape(w.shape[:-1] + (4 * Hp,))

    wx_p = pad_gate_cols(wx)                                            # (Din, 4Hp)
    b_p = pad_gate_cols(b.reshape(1, 4 * H)).reshape(4 * Hp)            # (4Hp,)
    wh_p = pad_gate_cols(jnp.pad(wh, ((0, Hp - H), (0, 0)))).astype(jnp.bfloat16)  # (Hp, 4Hp)

    # Hoisted input projection: one MXU-efficient matmul over all T*B rows.
    gx = matmul_bias(x_tbd.reshape(T * B, Din), wx_p, b_p)              # (T*B, 4Hp) f32
    gx = gx.reshape(T, B, 4 * Hp)
    gx = jnp.pad(gx, ((0, Tp - T), (0, Bp - B), (0, 0)))

    kernel = _make_slstm_kernel(T, TC, Hp)
    h_seq, c_fin = pl.pallas_call(
        kernel,
        out_shape=(jax.ShapeDtypeStruct((Tp, Bp, Hp), jnp.float32),
                   jax.ShapeDtypeStruct((Bp, Hp), jnp.float32)),
        grid_spec=pltpu.PrefetchScalarGridSpec(
            num_scalar_prefetch=0,
            grid=(Tp // TC,),
            in_specs=[pl.BlockSpec((TC, Bp, 4 * Hp), lambda t: (t, 0, 0)),
                      # Constant index map -> DMA'd once (pl.Buffered(1) could halve its
                      # VMEM footprint at large H; left default for portability).
                      pl.BlockSpec((Hp, 4 * Hp), lambda t: (0, 0))],
            out_specs=[pl.BlockSpec((TC, Bp, Hp), lambda t: (t, 0, 0)),
                       pl.BlockSpec((Bp, Hp), lambda t: (0, 0))],
            scratch_shapes=[pltpu.VMEM((Bp, Hp), jnp.float32)] * 4),
        compiler_params=pltpu.CompilerParams(dimension_semantics=("arbitrary",)),
    )(gx, wh_p)
    return h_seq[:T, :B, :H], c_fin[:B, :H]


# ---------------------------------------------------------------------------
# Block epilogue: LayerNorm(GELU(lstm_out @ Wp + bp) + residual), row-tiled.
# LayerNorm affine params stay at default init (weight=1, bias=0) so they fold out.
# ---------------------------------------------------------------------------
def _proj_norm_kernel(x_ref, w_ref, b_ref, r_ref, o_ref):
    y = jnp.dot(x_ref[...], w_ref[...], preferred_element_type=jnp.float32) + b_ref[...]
    z = _gelu(y) + r_ref[...]
    mean = jnp.mean(z, axis=-1, keepdims=True)
    zc = z - mean
    var = jnp.mean(zc * zc, axis=-1, keepdims=True)
    o_ref[...] = zc * lax.rsqrt(var + 1e-5)


def proj_norm(x, w, b, resid, *, tm=256):
    """x: (M, H) f32, w: (H, D), b: (D,), resid: (M, D) -> (M, D) f32."""
    M, H = x.shape
    D = w.shape[1]
    tm = min(tm, _round_up(M, 8))
    Mp = _round_up(M, tm)
    xp = jnp.pad(x, ((0, Mp - M), (0, 0))).astype(jnp.bfloat16)
    rp = jnp.pad(resid, ((0, Mp - M), (0, 0)))
    out = pl.pallas_call(
        _proj_norm_kernel,
        out_shape=jax.ShapeDtypeStruct((Mp, D), jnp.float32),
        grid_spec=pltpu.PrefetchScalarGridSpec(
            num_scalar_prefetch=0,
            grid=(Mp // tm,),
            in_specs=[pl.BlockSpec((tm, H), lambda i: (i, 0)),
                      pl.BlockSpec((H, D), lambda i: (0, 0)),
                      pl.BlockSpec((1, D), lambda i: (0, 0)),
                      pl.BlockSpec((tm, D), lambda i: (i, 0))],
            out_specs=pl.BlockSpec((tm, D), lambda i: (i, 0))),
        compiler_params=pltpu.CompilerParams(dimension_semantics=("parallel",)),
    )(xp, w.astype(jnp.bfloat16), b.reshape(1, D).astype(jnp.float32), rp)
    return out[:M]


# ---------------------------------------------------------------------------
# Parameter init (deterministic, mirrors PyTorch shapes/semantics)
# ---------------------------------------------------------------------------
def _xavier_uniform(key, out_dim, in_dim):
    limit = math.sqrt(6.0 / (in_dim + out_dim))
    return jax.random.uniform(key, (out_dim, in_dim), jnp.float32, -limit, limit)


def init_params(key, vocab_size, embedding_size, hidden_size, num_layers, num_blocks):
    keys = jax.random.split(key, 2 + num_blocks)
    emb = _xavier_uniform(keys[0], vocab_size, embedding_size)          # (V, E)
    k = 1.0 / math.sqrt(hidden_size)
    blocks = []
    for bi in range(num_blocks):
        in_size = embedding_size if bi == 0 else hidden_size
        lkeys = jax.random.split(keys[2 + bi], num_layers * 3 + 1)
        layers = []
        for li in range(num_layers):
            d_in = in_size if li == 0 else hidden_size
            w_ih = jax.random.uniform(lkeys[3 * li + 0], (4 * hidden_size, d_in),
                                      jnp.float32, -k, k)
            w_hh = jax.random.uniform(lkeys[3 * li + 1], (4 * hidden_size, hidden_size),
                                      jnp.float32, -k, k)
            bias = jax.random.uniform(lkeys[3 * li + 2], (4 * hidden_size,),
                                      jnp.float32, -k, k)
            layers.append((w_ih.T, w_hh.T, bias))                       # (Din,4H),(H,4H),(4H,)
        proj_w = _xavier_uniform(lkeys[-1], in_size, hidden_size)       # torch (out=in, in=H)
        blocks.append({'lstm': layers,
                       'proj_w': proj_w.T,                              # (H, in_size)
                       'proj_b': jnp.zeros((in_size,), jnp.float32)})
    out_w = _xavier_uniform(keys[1], vocab_size, hidden_size)           # (V, H)
    return {'embedding': emb,
            'blocks': blocks,
            'out_w': out_w.T,                                           # (H, V)
            'out_b': jnp.zeros((vocab_size,), jnp.float32)}


# ---------------------------------------------------------------------------
# Forward pass
# ---------------------------------------------------------------------------
def xlstm_block_forward(x_btd, block_params, *, tc=16):
    B, T, D = x_btd.shape
    layer_in = jnp.transpose(x_btd, (1, 0, 2))               # (T, B, D) time-major
    hidden = []
    for (wx, wh, b) in block_params['lstm']:
        h_seq, c_fin = slstm_layer(layer_in, wx, wh, b, tc=tc)
        hidden.append([h_seq[-1], c_fin])                    # per-layer [h, c]
        layer_in = h_seq
    H = layer_in.shape[-1]
    lstm_out = jnp.transpose(layer_in, (1, 0, 2)).reshape(B * T, H)
    out = proj_norm(lstm_out, block_params['proj_w'], block_params['proj_b'],
                    x_btd.reshape(B * T, D))
    # dropout p=0.0 -> identity (omitted)
    return out.reshape(B, T, D), hidden


def xlstm_forward(tokens, params, *, tc=16):
    x = params['embedding'][tokens]                          # (B, T, E) gather = glue
    out = x
    hidden_states = []
    for blk in params['blocks']:
        out, hs = xlstm_block_forward(out, blk, tc=tc)
        hidden_states.append(hs)
    B, T, H = out.shape
    V = params['out_w'].shape[1]
    logits = matmul_bias(out.reshape(B * T, H), params['out_w'], params['out_b'])
    return logits.reshape(B, T, V), hidden_states


if __name__ == "__main__":
    vocab_size, embedding_size, hidden_size = 64, 32, 32
    num_layers, num_blocks = 2, 2
    B, T = 2, 8

    key = jax.random.PRNGKey(0)
    pkey, dkey = jax.random.split(key)
    params = init_params(pkey, vocab_size, embedding_size, hidden_size,
                         num_layers, num_blocks)
    tokens = jax.random.randint(dkey, (B, T), 0, vocab_size, dtype=jnp.int32)

    fwd = jax.jit(functools.partial(xlstm_forward, tc=16))
    logits, hidden_states = fwd(tokens, params)
    jax.block_until_ready((logits, hidden_states))

    assert logits.shape == (B, T, vocab_size)
    assert len(hidden_states) == num_blocks and len(hidden_states[0]) == num_layers
    assert hidden_states[0][0][0].shape == (B, hidden_size)
    assert hidden_states[0][0][1].shape == (B, hidden_size)
    assert bool(jnp.isfinite(logits).all())
    print("KERNEL_OK")
</pallas_src>

<mosaic_0001>
module attributes {stable_mosaic.version = 11 : i64} {
  func.func @_matmul_bias_kernel(%arg0: i32, %arg1: i32, %arg2: i32, %arg3: memref<16x128xbf16, #tpu.memory_space<vmem>>, %arg4: memref<128x256xbf16, #tpu.memory_space<vmem>>, %arg5: memref<1x256xf32, #tpu.memory_space<vmem>>, %arg6: memref<16x256xf32, #tpu.memory_space<vmem>>, %arg7: memref<16x256xf32, #tpu.memory_space<vmem>>) attributes {dimension_semantics = [#tpu.dimension_semantics<parallel>, #tpu.dimension_semantics<parallel>, #tpu.dimension_semantics<arbitrary>], iteration_bounds = array<i64: 1, 2, 1>, scalar_prefetch = 0 : i64, scratch_operands = 1 : i64, tpu.core_type = #tpu.core_type<tc>, window_params = [{transform_indices = @transform_0, window_bounds = array<i64: 16, 128>}, {transform_indices = @transform_1, window_bounds = array<i64: 128, 256>}, {transform_indices = @transform_2, window_bounds = array<i64: 1, 256>}, {transform_indices = @transform_3, window_bounds = array<i64: 16, 256>}]} {
    %c0_i32 = arith.constant 0 : i32
    %0 = arith.cmpi eq, %arg2, %c0_i32 : i32
    %1 = arith.extui %0 : i1 to i32
    %c0_i32_0 = arith.constant 0 : i32
    %2 = arith.cmpi ne, %1, %c0_i32_0 : i32
    scf.if %2 {
      %cst_10 = arith.constant 0.000000e+00 : f32
      %12 = vector.broadcast %cst_10 : f32 to vector<16x256xf32>
      %c0_11 = arith.constant 0 : index
      %c0_12 = arith.constant 0 : index
      %13 = vector.load %arg7[%c0_11, %c0_12] : memref<16x256xf32, #tpu.memory_space<vmem>>, vector<16x256xf32>
      tpu.vector_store %arg7[%c0_11, %c0_12], %12 {strides = array<i32>} : memref<16x256xf32, #tpu.memory_space<vmem>>, vector<16x256xf32>,
    } else {
    }
    %c0 = arith.constant 0 : index
    %c0_1 = arith.constant 0 : index
    %3 = vector.load %arg7[%c0, %c0_1] : memref<16x256xf32, #tpu.memory_space<vmem>>, vector<16x256xf32>
    %c0_2 = arith.constant 0 : index
    %c0_3 = arith.constant 0 : index
    %4 = vector.load %arg3[%c0_2, %c0_3] : memref<16x128xbf16, #tpu.memory_space<vmem>>, vector<16x128xbf16>
    %c0_4 = arith.constant 0 : index
    %c0_5 = arith.constant 0 : index
    %5 = vector.load %arg4[%c0_4, %c0_5] : memref<128x256xbf16, #tpu.memory_space<vmem>>, vector<128x256xbf16>
    %cst = arith.constant dense<0.000000e+00> : vector<16x256xf32>
    %6 = tpu.matmul %4, %5, %cst {dimension_numbers = #tpu.dot_dimension_numbers<[1], [0], [0], [1], [0, 0, 1, 1], [], []>} : vector<16x128xbf16>, vector<128x256xbf16>, vector<16x256xf32> -> vector<16x256xf32>
    %7 = arith.addf %3, %6 : vector<16x256xf32>
    %c0_6 = arith.constant 0 : index
    %c0_7 = arith.constant 0 : index
    %8 = vector.load %arg7[%c0_6, %c0_7] : memref<16x256xf32, #tpu.memory_space<vmem>>, vector<16x256xf32>
    tpu.vector_store %arg7[%c0_6, %c0_7], %7 {strides = array<i32>} : memref<16x256xf32, #tpu.memory_space<vmem>>, vector<16x256xf32>,
    %c0_i32_8 = arith.constant 0 : i32
    %9 = arith.cmpi eq, %arg2, %c0_i32_8 : i32
    %10 = arith.extui %9 : i1 to i32
    %c0_i32_9 = arith.constant 0 : i32
    %11 = arith.cmpi ne, %10, %c0_i32_9 : i32
    scf.if %11 {
      %c0_10 = arith.constant 0 : index
      %c0_11 = arith.constant 0 : index
      %12 = vector.load %arg7[%c0_10, %c0_11] : memref<16x256xf32, #tpu.memory_space<vmem>>, vector<16x256xf32>
      %c0_12 = arith.constant 0 : index
      %c0_13 = arith.constant 0 : index
      %13 = vector.load %arg5[%c0_12, %c0_13] : memref<1x256xf32, #tpu.memory_space<vmem>>, vector<1x256xf32>
      %14 = vector.broadcast %13 : vector<1x256xf32> to vector<16x256xf32>
      %15 = arith.addf %12, %14 : vector<16x256xf32>
      %c0_14 = arith.constant 0 : index
      %c0_15 = arith.constant 0 : index
      %16 = vector.load %arg6[%c0_14, %c0_15] : memref<16x256xf32, #tpu.memory_space<vmem>>, vector<16x256xf32>
      tpu.vector_store %arg6[%c0_14, %c0_15], %15 {strides = array<i32>} : memref<16x256xf32, #tpu.memory_space<vmem>>, vector<16x256xf32>,
    } else {
    }
    return
  }
  func.func @transform_0(%arg0: i32, %arg1: i32, %arg2: i32) -> (i32, i32) {
    %c0_i32 = arith.constant 0 : i32
    return %arg0, %arg2 : i32, i32
  }
  func.func @transform_1(%arg0: i32, %arg1: i32, %arg2: i32) -> (i32, i32) {
    %c0_i32 = arith.constant 0 : i32
    return %arg2, %arg1 : i32, i32
  }
  func.func @transform_2(%arg0: i32, %arg1: i32, %arg2: i32) -> (i32, i32) {
    %c0_i32 = arith.constant 0 : i32
    %c0_i32_0 = arith.constant 0 : i32
    return %c0_i32, %arg1 : i32, i32
  }
  func.func @transform_3(%arg0: i32, %arg1: i32, %arg2: i32) -> (i32, i32) {
    %c0_i32 = arith.constant 0 : i32
    return %arg0, %arg1 : i32, i32
  }
}

module attributes {stable_mosaic.version = 11 : i64} {
  func.func @kernel(%arg0: i32, %arg1: memref<8x8x512xf32, #tpu.memory_space<vmem>>, %arg2: memref<128x512xbf16, #tpu.memory_space<vmem>>, %arg3: memref<8x8x128xf32, #tpu.memory_space<vmem>>, %arg4: memref<8x128xf32, #tpu.memory_space<vmem>>, %arg5: memref<8x128xf32, #tpu.memory_space<vmem>>, %arg6: memref<8x128xf32, #tpu.memory_space<vmem>>, %arg7: memref<8x128xf32, #tpu.memory_space<vmem>>, %arg8: memref<8x128xf32, #tpu.memory_space<vmem>>) attributes {dimension_semantics = [#tpu.dimension_semantics<arbitrary>], iteration_bounds = array<i64: 1>, scalar_prefetch = 0 : i64, scratch_operands = 4 : i64, tpu.core_type = #tpu.core_type<tc>, window_params = [{transform_indices = @transform_0, window_bounds = array<i64: 8, 8, 512>}, {pipeline_mode = #tpu.pipeline_mode<synchronous>, transform_indices = @transform_1, window_bounds = array<i64: 128, 512>}, {transform_indices = @transform_2, window_bounds = array<i64: 8, 8, 128>}, {pipeline_mode = #tpu.pipeline_mode<synchronous>, transform_indices = @transform_3, window_bounds = array<i64: 8, 128>}]} {
    %c0_i32 = arith.constant 0 : i32
    %0 = arith.cmpi eq, %arg0, %c0_i32 : i32
    %1 = arith.extui %0 : i1 to i32
    %c0_i32_0 = arith.constant 0 : i32
    %2 = arith.cmpi ne, %1, %c0_i32_0 : i32
    scf.if %2 {
      %cst_92 = arith.constant 0.000000e+00 : f32
      %365 = vector.broadcast %cst_92 : f32 to vector<8x128xf32>
      %c0_93 = arith.constant 0 : index
      %c0_94 = arith.constant 0 : index
      %366 = vector.load %arg5[%c0_93, %c0_94] : memref<8x128xf32, #tpu.memory_space<vmem>>, vector<8x128xf32>
      tpu.vector_store %arg5[%c0_93, %c0_94], %365 {strides = array<i32>} : memref<8x128xf32, #tpu.memory_space<vmem>>, vector<8x128xf32>,
      %cst_95 = arith.constant 0.000000e+00 : f32
      %367 = vector.broadcast %cst_95 : f32 to vector<8x128xf32>
      %c0_96 = arith.constant 0 : index
      %c0_97 = arith.constant 0 : index
      %368 = vector.load %arg6[%c0_96, %c0_97] : memref<8x128xf32, #tpu.memory_space<vmem>>, vector<8x128xf32>
      tpu.vector_store %arg6[%c0_96, %c0_97], %367 {strides = array<i32>} : memref<8x128xf32, #tpu.memory_space<vmem>>, vector<8x128xf32>,
      %cst_98 = arith.constant 0.000000e+00 : f32
      %369 = vector.broadcast %cst_98 : f32 to vector<8x128xf32>
      %c0_99 = arith.constant 0 : index
      %c0_100 = arith.constant 0 : index
      %370 = vector.load %arg7[%c0_99, %c0_100] : memref<8x128xf32, #tpu.memory_space<vmem>>, vector<8x128xf32>
      tpu.vector_store %arg7[%c0_99, %c0_100], %369 {strides = array<i32>} : memref<8x128xf32, #tpu.memory_space<vmem>>, vector<8x128xf32>,
      %cst_101 = arith.constant 0.000000e+00 : f32
      %371 = vector.broadcast %cst_101 : f32 to vector<8x128xf32>
      %c0_102 = arith.constant 0 : index
      %c0_103 = arith.constant 0 : index
      %372 = vector.load %arg8[%c0_102, %c0_103] : memref<8x128xf32, #tpu.memory_space<vmem>>, vector<8x128xf32>
      tpu.vector_store %arg8[%c0_102, %c0_103], %371 {strides = array<i32>} : memref<8x128xf32, #tpu.memory_space<vmem>>, vector<8x128xf32>,
    } else {
    }
    %c0 = arith.constant 0 : index
    %c0_1 = arith.constant 0 : index
    %3 = vector.load %arg2[%c0, %c0_1] : memref<128x512xbf16, #tpu.memory_space<vmem>>, vector<128x512xbf16>
    %c0_2 = arith.constant 0 : index
    %c0_3 = arith.constant 0 : index
    %4 = vector.load %arg5[%c0_2, %c0_3] : memref<8x128xf32, #tpu.memory_space<vmem>>, vector<8x128xf32>
    %c0_4 = arith.constant 0 : index
    %c0_5 = arith.constant 0 : index
    %5 = vector.load %arg6[%c0_4, %c0_5] : memref<8x128xf32, #tpu.memory_space<vmem>>, vector<8x128xf32>
    %c0_6 = arith.constant 0 : index
    %c0_7 = arith.constant 0 : index
    %6 = vector.load %arg7[%c0_6, %c0_7] : memref<8x128xf32, #tpu.memory_space<vmem>>, vector<8x128xf32>
    %c0_8 = arith.constant 0 : index
    %c0_9 = arith.constant 0 : index
    %7 = vector.load %arg8[%c0_8, %c0_9] : memref<8x128xf32, #tpu.memory_space<vmem>>, vector<8x128xf32>
    %c0_i32_10 = arith.constant 0 : i32
    %8 = arith.index_cast %c0_i32_10 : i32 to index
    %c0_11 = arith.constant 0 : index
    %c0_12 = arith.constant 0 : index
    %9 = vector.load %arg1[%8, %c0_11, %c0_12] : memref<8x8x512xf32, #tpu.memory_space<vmem>>, vector<1x8x512xf32>
    %10 = vector.shape_cast %9 : vector<1x8x512xf32> to vector<8x512xf32>
    %11 = arith.truncf %4 : vector<8x128xf32> to vector<8x128xbf16>
    %cst = arith.constant dense<0.000000e+00> : vector<8x512xf32>
    %12 = tpu.matmul %11, %3, %cst {dimension_numbers = #tpu.dot_dimension_numbers<[1], [0], [0], [1], [0, 0, 1, 1], [], []>} : vector<8x128xbf16>, vector<128x512xbf16>, vector<8x512xf32> -> vector<8x512xf32>
    %13 = arith.addf %10, %12 : vector<8x512xf32>
    %14 = vector.extract_strided_slice %13 {offsets = [0, 0], sizes = [8, 128], strides = [1, 1]} : vector<8x512xf32> to vector<8x128xf32>
    %15 = vector.extract_strided_slice %13 {offsets = [0, 128], sizes = [8, 128], strides = [1, 1]} : vector<8x512xf32> to vector<8x128xf32>
    %16 = vector.extract_strided_slice %13 {offsets = [0, 256], sizes = [8, 128], strides = [1, 1]} : vector<8x512xf32> to vector<8x128xf32>
    %17 = vector.extract_strided_slice %13 {offsets = [0, 384], sizes = [8, 128], strides = [1, 1]} : vector<8x512xf32> to vector<8x128xf32>
    %18 = math.tanh %16 : vector<8x128xf32>
    %19 = arith.negf %17 : vector<8x128xf32>
    %20 = math.exp %19 : vector<8x128xf32>
    %cst_13 = arith.constant 1.000000e+00 : f32
    %21 = vector.broadcast %cst_13 : f32 to vector<8x128xf32>
    %22 = arith.addf %21, %20 : vector<8x128xf32>
    %23 = arith.divf %21, %22 : vector<8x128xf32>
    %24 = arith.addf %15, %7 : vector<8x128xf32>
    %25 = arith.maximumf %24, %14 : vector<8x128xf32>
    %26 = arith.subf %14, %25 : vector<8x128xf32>
    %27 = math.exp %26 : vector<8x128xf32>
    %28 = arith.addf %15, %7 : vector<8x128xf32>
    %29 = arith.subf %28, %25 : vector<8x128xf32>
    %30 = math.exp %29 : vector<8x128xf32>
    %31 = arith.mulf %30, %5 : vector<8x128xf32>
    %32 = arith.mulf %27, %18 : vector<8x128xf32>
    %33 = arith.addf %31, %32 : vector<8x128xf32>
    %34 = arith.mulf %30, %6 : vector<8x128xf32>
    %35 = arith.addf %34, %27 : vector<8x128xf32>
    %36 = arith.mulf %23, %33 : vector<8x128xf32>
    %cst_14 = arith.constant 9.99999997E-7 : f32
    %37 = vector.broadcast %cst_14 : f32 to vector<8x128xf32>
    %38 = arith.maximumf %35, %37 : vector<8x128xf32>
    %39 = tpu.reciprocal %38 {approx = true} : vector<8x128xf32> -> vector<8x128xf32>
    %40 = arith.mulf %36, %39 : vector<8x128xf32>
    %41 = arith.index_cast %c0_i32_10 : i32 to index
    %c0_15 = arith.constant 0 : index
    %c0_16 = arith.constant 0 : index
    %42 = vector.load %arg3[%41, %c0_15, %c0_16] : memref<8x8x128xf32, #tpu.memory_space<vmem>>, vector<1x8x128xf32>
    %43 = vector.shape_cast %42 : vector<1x8x128xf32> to vector<8x128xf32>
    %44 = vector.shape_cast %40 : vector<8x128xf32> to vector<1x8x128xf32>
    tpu.vector_store %arg3[%41, %c0_15, %c0_16], %44 {strides = array<i32>} : memref<8x8x128xf32, #tpu.memory_space<vmem>>, vector<1x8x128xf32>,
    %c8_i32 = arith.constant 8 : i32
    %45 = arith.muli %arg0, %c8_i32 : i32
    %46 = arith.addi %45, %c0_i32_10 : i32
    %c8_i32_17 = arith.constant 8 : i32
    %47 = arith.cmpi slt, %46, %c8_i32_17 : i32
    %48 = arith.select %47, %40, %4 : vector<8x128xf32>
    %49 = arith.select %47, %33, %5 : vector<8x128xf32>
    %50 = arith.select %47, %35, %6 : vector<8x128xf32>
    %51 = arith.select %47, %25, %7 : vector<8x128xf32>
    %c1_i32 = arith.constant 1 : i32
    %52 = arith.index_cast %c1_i32 : i32 to index
    %c0_18 = arith.constant 0 : index
    %c0_19 = arith.constant 0 : index
    %53 = vector.load %arg1[%52, %c0_18, %c0_19] : memref<8x8x512xf32, #tpu.memory_space<vmem>>, vector<1x8x512xf32>
    %54 = vector.shape_cast %53 : vector<1x8x512xf32> to vector<8x512xf32>
    %55 = arith.truncf %48 : vector<8x128xf32> to vector<8x128xbf16>
    %cst_20 = arith.constant dense<0.000000e+00> : vector<8x512xf32>
    %56 = tpu.matmul %55, %3, %cst_20 {dimension_numbers = #tpu.dot_dimension_numbers<[1], [0], [0], [1], [0, 0, 1, 1], [], []>} : vector<8x128xbf16>, vector<128x512xbf16>, vector<8x512xf32> -> vector<8x512xf32>
    %57 = arith.addf %54, %56 : vector<8x512xf32>
    %58 = vector.extract_strided_slice %57 {offsets = [0, 0], sizes = [8, 128], strides = [1, 1]} : vector<8x512xf32> to vector<8x128xf32>
    %59 = vector.extract_strided_slice %57 {offsets = [0, 128], sizes = [8, 128], strides = [1, 1]} : vector<8x512xf32> to vector<8x128xf32>
    %60 = vector.extract_strided_slice %57 {offsets = [0, 256], sizes = [8, 128], strides = [1, 1]} : vector<8x512xf32> to vector<8x128xf32>
    %61 = vector.extract_strided_slice %57 {offsets = [0, 384], sizes = [8, 128], strides = [1, 1]} : vector<8x512xf32> to vector<8x128xf32>
    %62 = math.tanh %60 : vector<8x128xf32>
    %63 = arith.negf %61 : vector<8x128xf32>
    %64 = math.exp %63 : vector<8x128xf32>
    %cst_21 = arith.constant 1.000000e+00 : f32
    %65 = vector.broadcast %cst_21 : f32 to vector<8x128xf32>
    %66 = arith.addf %65, %64 : vector<8x128xf32>
    %67 = arith.divf %65, %66 : vector<8x128xf32>
    %68 = arith.addf %59, %51 : vector<8x128xf32>
    %69 = arith.maximumf %68, %58 : vector<8x128xf32>
    %70 = arith.subf %58, %69 : vector<8x128xf32>
    %71 = math.exp %70 : vector<8x128xf32>
    %72 = arith.addf %59, %51 : vector<8x128xf32>
    %73 = arith.subf %72, %69 : vector<8x128xf32>
    %74 = math.exp %73 : vector<8x128xf32>
    %75 = arith.mulf %74, %49 : vector<8x128xf32>
    %76 = arith.mulf %71, %62 : vector<8x128xf32>
    %77 = arith.addf %75, %76 : vector<8x128xf32>
    %78 = arith.mulf %74, %50 : vector<8x128xf32>
    %79 = arith.addf %78, %71 : vector<8x128xf32>
    %80 = arith.mulf %67, %77 : vector<8x128xf32>
    %cst_22 = arith.constant 9.99999997E-7 : f32
    %81 = vector.broadcast %cst_22 : f32 to vector<8x128xf32>
    %82 = arith.maximumf %79, %81 : vector<8x128xf32>
    %83 = tpu.reciprocal %82 {approx = true} : vector<8x128xf32> -> vector<8x128xf32>
    %84 = arith.mulf %80, %83 : vector<8x128xf32>
    %85 = arith.index_cast %c1_i32 : i32 to index
    %c0_23 = arith.constant 0 : index
    %c0_24 = arith.constant 0 : index
    %86 = vector.load %arg3[%85, %c0_23, %c0_24] : memref<8x8x128xf32, #tpu.memory_space<vmem>>, vector<1x8x128xf32>
    %87 = vector.shape_cast %86 : vector<1x8x128xf32> to vector<8x128xf32>
    %88 = vector.shape_cast %84 : vector<8x128xf32> to vector<1x8x128xf32>
    tpu.vector_store %arg3[%85, %c0_23, %c0_24], %88 {strides = array<i32>} : memref<8x8x128xf32, #tpu.memory_space<vmem>>, vector<1x8x128xf32>,
    %c8_i32_25 = arith.constant 8 : i32
    %89 = arith.muli %arg0, %c8_i32_25 : i32
    %90 = arith.addi %89, %c1_i32 : i32
    %c8_i32_26 = arith.constant 8 : i32
    %91 = arith.cmpi slt, %90, %c8_i32_26 : i32
    %92 = arith.select %91, %84, %48 : vector<8x128xf32>
    %93 = arith.select %91, %77, %49 : vector<8x128xf32>
    %94 = arith.select %91, %79, %50 : vector<8x128xf32>
    %95 = arith.select %91, %69, %51 : vector<8x128xf32>
    %c2_i32 = arith.constant 2 : i32
    %96 = arith.index_cast %c2_i32 : i32 to index
    %c0_27 = arith.constant 0 : index
    %c0_28 = arith.constant 0 : index
    %97 = vector.load %arg1[%96, %c0_27, %c0_28] : memref<8x8x512xf32, #tpu.memory_space<vmem>>, vector<1x8x512xf32>
    %98 = vector.shape_cast %97 : vector<1x8x512xf32> to vector<8x512xf32>
    %99 = arith.truncf %92 : vector<8x128xf32> to vector<8x128xbf16>
    %cst_29 = arith.constant dense<0.000000e+00> : vector<8x512xf32>
    %100 = tpu.matmul %99, %3, %cst_29 {dimension_numbers = #tpu.dot_dimension_numbers<[1], [0], [0], [1], [0, 0, 1, 1], [], []>} : vector<8x128xbf16>, vector<128x512xbf16>, vector<8x512xf32> -> vector<8x512xf32>
    %101 = arith.addf %98, %100 : vector<8x512xf32>
    %102 = vector.extract_strided_slice %101 {offsets = [0, 0], sizes = [8, 128], strides = [1, 1]} : vector<8x512xf32> to vector<8x128xf32>
    %103 = vector.extract_strided_slice %101 {offsets = [0, 128], sizes = [8, 128], strides = [1, 1]} : vector<8x512xf32> to vector<8x128xf32>
    %104 = vector.extract_strided_slice %101 {offsets = [0, 256], sizes = [8, 128], strides = [1, 1]} : vector<8x512xf32> to vector<8x128xf32>
    %105 = vector.extract_strided_slice %101 {offsets = [0, 384], sizes = [8, 128], strides = [1, 1]} : vector<8x512xf32> to vector<8x128xf32>
    %106 = math.tanh %104 : vector<8x128xf32>
    %107 = arith.negf %105 : vector<8x128xf32>
    %108 = math.exp %107 : vector<8x128xf32>
    %cst_30 = arith.constant 1.000000e+00 : f32
    %109 = vector.broadcast %cst_30 : f32 to vector<8x128xf32>
    %110 = arith.addf %109, %108 : vector<8x128xf32>
    %111 = arith.divf %109, %110 : vector<8x128xf32>
    %112 = arith.addf %103, %95 : vector<8x128xf32>
    %113 = arith.maximumf %112, %102 : vector<8x128xf32>
    %114 = arith.subf %102, %113 : vector<8x128xf32>
    %115 = math.exp %114 : vector<8x128xf32>
    %116 = arith.addf %103, %95 : vector<8x128xf32>
    %117 = arith.subf %116, %113 : vector<8x128xf32>
    %118 = math.exp %117 : vector<8x128xf32>
    %119 = arith.mulf %118, %93 : vector<8x128xf32>
    %120 = arith.mulf %115, %106 : vector<8x128xf32>
    %121 = arith.addf %119, %120 : vector<8x128xf32>
    %122 = arith.mulf %118, %94 : vector<8x128xf32>
    %123 = arith.addf %122, %115 : vector<8x128xf32>
    %124 = arith.mulf %111, %121 : vector<8x128xf32>
    %cst_31 = arith.constant 9.99999997E-7 : f32
    %125 = vector.broadcast %cst_31 : f32 to vector<8x128xf32>
    %126 = arith.maximumf %123, %125 : vector<8x128xf32>
    %127 = tpu.reciprocal %126 {approx = true} : vector<8x128xf32> -> vector<8x128xf32>
    %128 = arith.mulf %124, %127 : vector<8x128xf32>
    %129 = arith.index_cast %c2_i32 : i32 to index
    %c0_32 = arith.constant 0 : index
    %c0_33 = arith.constant 0 : index
    %130 = vector.load %arg3[%129, %c0_32, %c0_33] : memref<8x8x128xf32, #tpu.memory_space<vmem>>, vector<1x8x128xf32>
    %131 = vector.shape_cast %130 : vector<1x8x128xf32> to vector<8x128xf32>
    %132 = vector.shape_cast %128 : vector<8x128xf32> to vector<1x8x128xf32>
    tpu.vector_store %arg3[%129, %c0_32, %c0_33], %132 {strides = array<i32>} : memref<8x8x128xf32, #tpu.memory_space<vmem>>, vector<1x8x128xf32>,
    %c8_i32_34 = arith.constant 8 : i32
    %133 = arith.muli %arg0, %c8_i32_34 : i32
    %134 = arith.addi %133, %c2_i32 : i32
    %c8_i32_35 = arith.constant 8 : i32
    %135 = arith.cmpi slt, %134, %c8_i32_35 : i32
    %136 = arith.select %135, %128, %92 : vector<8x128xf32>
    %137 = arith.select %135, %121, %93 : vector<8x128xf32>
    %138 = arith.select %135, %123, %94 : vector<8x128xf32>
    %139 = arith.select %135, %113, %95 : vector<8x128xf32>
    %c3_i32 = arith.constant 3 : i32
    %140 = arith.index_cast %c3_i32 : i32 to index
    %c0_36 = arith.constant 0 : index
    %c0_37 = arith.constant 0 : index
    %141 = vector.load %arg1[%140, %c0_36, %c0_37] : memref<8x8x512xf32, #tpu.memory_space<vmem>>, vector<1x8x512xf32>
    %142 = vector.shape_cast %141 : vector<1x8x512xf32> to vector<8x512xf32>
    %143 = arith.truncf %136 : vector<8x128xf32> to vector<8x128xbf16>
    %cst_38 = arith.constant dense<0.000000e+00> : vector<8x512xf32>
    %144 = tpu.matmul %143, %3, %cst_38 {dimension_numbers = #tpu.dot_dimension_numbers<[1], [0], [0], [1], [0, 0, 1, 1], [], []>} : vector<8x128xbf16>, vector<128x512xbf16>, vector<8x512xf32> -> vector<8x512xf32>
    %145 = arith.addf %142, %144 : vector<8x512xf32>
    %146 = vector.extract_strided_slice %145 {offsets = [0, 0], sizes = [8, 128], strides = [1, 1]} : vector<8x512xf32> to vector<8x128xf32>
    %147 = vector.extract_strided_slice %145 {offsets = [0, 128], sizes = [8, 128], strides = [1, 1]} : vector<8x512xf32> to vector<8x128xf32>
    %148 = vector.extract_strided_slice %145 {offsets = [0, 256], sizes = [8, 128], strides = [1, 1]} : vector<8x512xf32> to vector<8x128xf32>
    %149 = vector.extract_strided_slice %145 {offsets = [0, 384], sizes = [8, 128], strides = [1, 1]} : vector<8x512xf32> to vector<8x128xf32>
    %150 = math.tanh %148 : vector<8x128xf32>
    %151 = arith.negf %149 : vector<8x128xf32>
    %152 = math.exp %151 : vector<8x128xf32>
    %cst_39 = arith.constant 1.000000e+00 : f32
    %153 = vector.broadcast %cst_39 : f32 to vector<8x128xf32>
    %154 = arith.addf %153, %152 : vector<8x128xf32>
    %155 = arith.divf %153, %154 : vector<8x128xf32>
    %156 = arith.addf %147, %139 : vector<8x128xf32>
    %157 = arith.maximumf %156, %146 : vector<8x128xf32>
    %158 = arith.subf %146, %157 : vector<8x128xf32>
    %159 = math.exp %158 : vector<8x128xf32>
    %160 = arith.addf %147, %139 : vector<8x128xf32>
    %161 = arith.subf %160, %157 : vector<8x128xf32>
    %162 = math.exp %161 : vector<8x128xf32>
    %163 = arith.mulf %162, %137 : vector<8x128xf32>
    %164 = arith.mulf %159, %150 : vector<8x128xf32>
    %165 = arith.addf %163, %164 : vector<8x128xf32>
    %166 = arith.mulf %162, %138 : vector<8x128xf32>
    %167 = arith.addf %166, %159 : vector<8x128xf32>
    %168 = arith.mulf %155, %165 : vector<8x128xf32>
    %cst_40 = arith.constant 9.99999997E-7 : f32
    %169 = vector.broadcast %cst_40 : f32 to vector<8x128xf32>
    %170 = arith.maximumf %167, %169 : vector<8x128xf32>
    %171 = tpu.reciprocal %170 {approx = true} : vector<8x128xf32> -> vector<8x128xf32>
    %172 = arith.mulf %168, %171 : vector<8x128xf32>
    %173 = arith.index_cast %c3_i32 : i32 to index
    %c0_41 = arith.constant 0 : index
    %c0_42 = arith.constant 0 : index
    %174 = vector.load %arg3[%173, %c0_41, %c0_42] : memref<8x8x128xf32, #tpu.memory_space<vmem>>, vector<1x8x128xf32>
    %175 = vector.shape_cast %174 : vector<1x8x128xf32> to vector<8x128xf32>
    %176 = vector.shape_cast %172 : vector<8x128xf32> to vector<1x8x128xf32>
    tpu.vector_store %arg3[%173, %c0_41, %c0_42], %176 {strides = array<i32>} : memref<8x8x128xf32, #tpu.memory_space<vmem>>, vector<1x8x128xf32>,
    %c8_i32_43 = arith.constant 8 : i32
    %177 = arith.muli %arg0, %c8_i32_43 : i32
    %178 = arith.addi %177, %c3_i32 : i32
    %c8_i32_44 = arith.constant 8 : i32
    %179 = arith.cmpi slt, %178, %c8_i32_44 : i32
    %180 = arith.select %179, %172, %136 : vector<8x128xf32>
    %181 = arith.select %179, %165, %137 : vector<8x128xf32>
    %182 = arith.select %179, %167, %138 : vector<8x128xf32>
    %183 = arith.select %179, %157, %139 : vector<8x128xf32>
    %c4_i32 = arith.constant 4 : i32
    %184 = arith.index_cast %c4_i32 : i32 to index
    %c0_45 = arith.constant 0 : index
    %c0_46 = arith.constant 0 : index
    %185 = vector.load %arg1[%184, %c0_45, %c0_46] : memref<8x8x512xf32, #tpu.memory_space<vmem>>, vector<1x8x512xf32>
    %186 = vector.shape_cast %185 : vector<1x8x512xf32> to vector<8x512xf32>
    %187 = arith.truncf %180 : vector<8x128xf32> to vector<8x128xbf16>
    %cst_47 = arith.constant dense<0.000000e+00> : vector<8x512xf32>
    %188 = tpu.matmul %187, %3, %cst_47 {dimension_numbers = #tpu.dot_dimension_numbers<[1], [0], [0], [1], [0, 0, 1, 1], [], []>} : vector<8x128xbf16>, vector<128x512xbf16>, vector<8x512xf32> -> vector<8x512xf32>
    %189 = arith.addf %186, %188 : vector<8x512xf32>
    %190 = vector.extract_strided_slice %189 {offsets = [0, 0], sizes = [8, 128], strides = [1, 1]} : vector<8x512xf32> to vector<8x128xf32>
    %191 = vector.extract_strided_slice %189 {offsets = [0, 128], sizes = [8, 128], strides = [1, 1]} : vector<8x512xf32> to vector<8x128xf32>
    %192 = vector.extract_strided_slice %189 {offsets = [0, 256], sizes = [8, 128], strides = [1, 1]} : vector<8x512xf32> to vector<8x128xf32>
    %193 = vector.extract_strided_slice %189 {offsets = [0, 384], sizes = [8, 128], strides = [1, 1]} : vector<8x512xf32> to vector<8x128xf32>
    %194 = math.tanh %192 : vector<8x128xf32>
    %195 = arith.negf %193 : vector<8x128xf32>
    %196 = math.exp %195 : vector<8x128xf32>
    %cst_48 = arith.constant 1.000000e+00 : f32
    %197 = vector.broadcast %cst_48 : f32 to vector<8x128xf32>
    %198 = arith.addf %197, %196 : vector<8x128xf32>
    %199 = arith.divf %197, %198 : vector<8x128xf32>
    %200 = arith.addf %191, %183 : vector<8x128xf32>
    %201 = arith.maximumf %200, %190 : vector<8x128xf32>
    %202 = arith.subf %190, %201 : vector<8x128xf32>
    %203 = math.exp %202 : vector<8x128xf32>
    %204 = arith.addf %191, %183 : vector<8x128xf32>
    %205 = arith.subf %204, %201 : vector<8x128xf32>
    %206 = math.exp %205 : vector<8x128xf32>
    %207 = arith.mulf %206, %181 : vector<8x128xf32>
    %208 = arith.mulf %203, %194 : vector<8x128xf32>
    %209 = arith.addf %207, %208 : vector<8x128xf32>
    %210 = arith.mulf %206, %182 : vector<8x128xf32>
    %211 = arith.addf %210, %203 : vector<8x128xf32>
    %212 = arith.mulf %199, %209 : vector<8x128xf32>
    %cst_49 = arith.constant 9.99999997E-7 : f32
    %213 = vector.broadcast %cst_49 : f32 to vector<8x128xf32>
    %214 = arith.maximumf %211, %213 : vector<8x128xf32>
    %215 = tpu.reciprocal %214 {approx = true} : vector<8x128xf32> -> vector<8x128xf32>
    %216 = arith.mulf %212, %215 : vector<8x128xf32>
    %217 = arith.index_cast %c4_i32 : i32 to index
    %c0_50 = arith.constant 0 : index
    %c0_51 = arith.constant 0 : index
    %218 = vector.load %arg3[%217, %c0_50, %c0_51] : memref<8x8x128xf32, #tpu.memory_space<vmem>>, vector<1x8x128xf32>
    %219 = vector.shape_cast %218 : vector<1x8x128xf32> to vector<8x128xf32>
    %220 = vector.shape_cast %216 : vector<8x128xf32> to vector<1x8x128xf32>
    tpu.vector_store %arg3[%217, %c0_50, %c0_51], %220 {strides = array<i32>} : memref<8x8x128xf32, #tpu.memory_space<vmem>>, vector<1x8x128xf32>,
    %c8_i32_52 = arith.constant 8 : i32
    %221 = arith.muli %arg0, %c8_i32_52 : i32
    %222 = arith.addi %221, %c4_i32 : i32
    %c8_i32_53 = arith.constant 8 : i32
    %223 = arith.cmpi slt, %222, %c8_i32_53 : i32
    %224 = arith.select %223, %216, %180 : vector<8x128xf32>
    %225 = arith.select %223, %209, %181 : vector<8x128xf32>
    %226 = arith.select %223, %211, %182 : vector<8x128xf32>
    %227 = arith.select %223, %201, %183 : vector<8x128xf32>
    %c5_i32 = arith.constant 5 : i32
    %228 = arith.index_cast %c5_i32 : i32 to index
    %c0_54 = arith.constant 0 : index
    %c0_55 = arith.constant 0 : index
    %229 = vector.load %arg1[%228, %c0_54, %c0_55] : memref<8x8x512xf32, #tpu.memory_space<vmem>>, vector<1x8x512xf32>
    %230 = vector.shape_cast %229 : vector<1x8x512xf32> to vector<8x512xf32>
    %231 = arith.truncf %224 : vector<8x128xf32> to vector<8x128xbf16>
    %cst_56 = arith.constant dense<0.000000e+00> : vector<8x512xf32>
    %232 = tpu.matmul %231, %3, %cst_56 {dimension_numbers = #tpu.dot_dimension_numbers<[1], [0], [0], [1], [0, 0, 1, 1], [], []>} : vector<8x128xbf16>, vector<128x512xbf16>, vector<8x512xf32> -> vector<8x512xf32>
    %233 = arith.addf %230, %232 : vector<8x512xf32>
    %234 = vector.extract_strided_slice %233 {offsets = [0, 0], sizes = [8, 128], strides = [1, 1]} : vector<8x512xf32> to vector<8x128xf32>
    %235 = vector.extract_strided_slice %233 {offsets = [0, 128], sizes = [8, 128], strides = [1, 1]} : vector<8x512xf32> to vector<8x128xf32>
    %236 = vector.extract_strided_slice %233 {offsets = [0, 256], sizes = [8, 128], strides = [1, 1]} : vector<8x512xf32> to vector<8x128xf32>
    %237 = vector.extract_strided_slice %233 {offsets = [0, 384], sizes = [8, 128], strides = [1, 1]} : vector<8x512xf32> to vector<8x128xf32>
    %238 = math.tanh %236 : vector<8x128xf32>
    %239 = arith.negf %237 : vector<8x128xf32>
    %240 = math.exp %239 : vector<8x128xf32>
    %cst_57 = arith.constant 1.000000e+00 : f32
    %241 = vector.broadcast %cst_57 : f32 to vector<8x128xf32>
    %242 = arith.addf %241, %240 : vector<8x128xf32>
    %243 = arith.divf %241, %242 : vector<8x128xf32>
    %244 = arith.addf %235, %227 : vector<8x128xf32>
    %245 = arith.maximumf %244, %234 : vector<8x128xf32>
    %246 = arith.subf %234, %245 : vector<8x128xf32>
    %247 = math.exp %246 : vector<8x128xf32>
    %248 = arith.addf %235, %227 : vector<8x128xf32>
    %249 = arith.subf %248, %245 : vector<8x128xf32>
    %250 = math.exp %249 : vector<8x128xf32>
    %251 = arith.mulf %250, %225 : vector<8x128xf32>
    %252 = arith.mulf %247, %238 : vector<8x128xf32>
    %253 = arith.addf %251, %252 : vector<8x128xf32>
    %254 = arith.mulf %250, %226 : vector<8x128xf32>
    %255 = arith.addf %254, %247 : vector<8x128xf32>
    %256 = arith.mulf %243, %253 : vector<8x128xf32>
    %cst_58 = arith.constant 9.99999997E-7 : f32
    %257 = vector.broadcast %cst_58 : f32 to vector<8x128xf32>
    %258 = arith.maximumf %255, %257 : vector<8x128xf32>
    %259 = tpu.reciprocal %258 {approx = true} : vector<8x128xf32> -> vector<8x128xf32>
    %260 = arith.mulf %256, %259 : vector<8x128xf32>
    %261 = arith.index_cast %c5_i32 : i32 to index
    %c0_59 = arith.constant 0 : index
    %c0_60 = arith.constant 0 : index
    %262 = vector.load %arg3[%261, %c0_59, %c0_60] : memref<8x8x128xf32, #tpu.memory_space<vmem>>, vector<1x8x128xf32>
    %263 = vector.shape_cast %262 : vector<1x8x128xf32> to vector<8x128xf32>
    %264 = vector.shape_cast %260 : vector<8x128xf32> to vector<1x8x128xf32>
    tpu.vector_store %arg3[%261, %c0_59, %c0_60], %264 {strides = array<i32>} : memref<8x8x128xf32, #tpu.memory_space<vmem>>, vector<1x8x128xf32>,
    %c8_i32_61 = arith.constant 8 : i32
    %265 = arith.muli %arg0, %c8_i32_61 : i32
    %266 = arith.addi %265, %c5_i32 : i32
    %c8_i32_62 = arith.constant 8 : i32
    %267 = arith.cmpi slt, %266, %c8_i32_62 : i32
    %268 = arith.select %267, %260, %224 : vector<8x128xf32>
    %269 = arith.select %267, %253, %225 : vector<8x128xf32>
    %270 = arith.select %267, %255, %226 : vector<8x128xf32>
    %271 = arith.select %267, %245, %227 : vector<8x128xf32>
    %c6_i32 = arith.constant 6 : i32
    %272 = arith.index_cast %c6_i32 : i32 to index
    %c0_63 = arith.constant 0 : index
    %c0_64 = arith.constant 0 : index
    %273 = vector.load %arg1[%272, %c0_63, %c0_64] : memref<8x8x512xf32, #tpu.memory_space<vmem>>, vector<1x8x512xf32>
    %274 = vector.shape_cast %273 : vector<1x8x512xf32> to vector<8x512xf32>
    %275 = arith.truncf %268 : vector<8x128xf32> to vector<8x128xbf16>
    %cst_65 = arith.constant dense<0.000000e+00> : vector<8x512xf32>
    %276 = tpu.matmul %275, %3, %cst_65 {dimension_numbers = #tpu.dot_dimension_numbers<[1], [0], [0], [1], [0, 0, 1, 1], [], []>} : vector<8x128xbf16>, vector<128x512xbf16>, vector<8x512xf32> -> vector<8x512xf32>
    %277 = arith.addf %274, %276 : vector<8x512xf32>
    %278 = vector.extract_strided_slice %277 {offsets = [0, 0], sizes = [8, 128], strides = [1, 1]} : vector<8x512xf32> to vector<8x128xf32>
    %279 = vector.extract_strided_slice %277 {offsets = [0, 128], sizes = [8, 128], strides = [1, 1]} : vector<8x512xf32> to vector<8x128xf32>
    %280 = vector.extract_strided_slice %277 {offsets = [0, 256], sizes = [8, 128], strides = [1, 1]} : vector<8x512xf32> to vector<8x128xf32>
    %281 = vector.extract_strided_slice %277 {offsets = [0, 384], sizes = [8, 128], strides = [1, 1]} : vector<8x512xf32> to vector<8x128xf32>
    %282 = math.tanh %280 : vector<8x128xf32>
    %283 = arith.negf %281 : vector<8x128xf32>
    %284 = math.exp %283 : vector<8x128xf32>
    %cst_66 = arith.constant 1.000000e+00 : f32
    %285 = vector.broadcast %cst_66 : f32 to vector<8x128xf32>
    %286 = arith.addf %285, %284 : vector<8x128xf32>
    %287 = arith.divf %285, %286 : vector<8x128xf32>
    %288 = arith.addf %279, %271 : vector<8x128xf32>
    %289 = arith.maximumf %288, %278 : vector<8x128xf32>
    %290 = arith.subf %278, %289 : vector<8x128xf32>
    %291 = math.exp %290 : vector<8x128xf32>
    %292 = arith.addf %279, %271 : vector<8x128xf32>
    %293 = arith.subf %292, %289 : vector<8x128xf32>
    %294 = math.exp %293 : vector<8x128xf32>
    %295 = arith.mulf %294, %269 : vector<8x128xf32>
    %296 = arith.mulf %291, %282 : vector<8x128xf32>
    %297 = arith.addf %295, %296 : vector<8x128xf32>
    %298 = arith.mulf %294, %270 : vector<8x128xf32>
    %299 = arith.addf %298, %291 : vector<8x128xf32>
    %300 = arith.mulf %287, %297 : vector<8x128xf32>
    %cst_67 = arith.constant 9.99999997E-7 : f32
    %301 = vector.broadcast %cst_67 : f32 to vector<8x128xf32>
    %302 = arith.maximumf %299, %301 : vector<8x128xf32>
    %303 = tpu.reciprocal %302 {approx = true} : vector<8x128xf32> -> vector<8x128xf32>
    %304 = arith.mulf %300, %303 : vector<8x128xf32>
    %305 = arith.index_cast %c6_i32 : i32 to index
    %c0_68 = arith.constant 0 : index
    %c0_69 = arith.constant 0 : index
    %306 = vector.load %arg3[%305, %c0_68, %c0_69] : memref<8x8x128xf32, #tpu.memory_space<vmem>>, vector<1x8x128xf32>
    %307 = vector.shape_cast %306 : vector<1x8x128xf32> to vector<8x128xf32>
    %308 = vector.shape_cast %304 : vector<8x128xf32> to vector<1x8x128xf32>
    tpu.vector_store %arg3[%305, %c0_68, %c0_69], %308 {strides = array<i32>} : memref<8x8x128xf32, #tpu.memory_space<vmem>>, vector<1x8x128xf32>,
    %c8_i32_70 = arith.constant 8 : i32
    %309 = arith.muli %arg0, %c8_i32_70 : i32
    %310 = arith.addi %309, %c6_i32 : i32
    %c8_i32_71 = arith.constant 8 : i32
    %311 = arith.cmpi slt, %310, %c8_i32_71 : i32
    %312 = arith.select %311, %304, %268 : vector<8x128xf32>
    %313 = arith.select %311, %297, %269 : vector<8x128xf32>
    %314 = arith.select %311, %299, %270 : vector<8x128xf32>
    %315 = arith.select %311, %289, %271 : vector<8x128xf32>
    %c7_i32 = arith.constant 7 : i32
    %316 = arith.index_cast %c7_i32 : i32 to index
    %c0_72 = arith.constant 0 : index
    %c0_73 = arith.constant 0 : index
    %317 = vector.load %arg1[%316, %c0_72, %c0_73] : memref<8x8x512xf32, #tpu.memory_space<vmem>>, vector<1x8x512xf32>
    %318 = vector.shape_cast %317 : vector<1x8x512xf32> to vector<8x512xf32>
    %319 = arith.truncf %312 : vector<8x128xf32> to vector<8x128xbf16>
    %cst_74 = arith.constant dense<0.000000e+00> : vector<8x512xf32>
    %320 = tpu.matmul %319, %3, %cst_74 {dimension_numbers = #tpu.dot_dimension_numbers<[1], [0], [0], [1], [0, 0, 1, 1], [], []>} : vector<8x128xbf16>, vector<128x512xbf16>, vector<8x512xf32> -> vector<8x512xf32>
    %321 = arith.addf %318, %320 : vector<8x512xf32>
    %322 = vector.extract_strided_slice %321 {offsets = [0, 0], sizes = [8, 128], strides = [1, 1]} : vector<8x512xf32> to vector<8x128xf32>
    %323 = vector.extract_strided_slice %321 {offsets = [0, 128], sizes = [8, 128], strides = [1, 1]} : vector<8x512xf32> to vector<8x128xf32>
    %324 = vector.extract_strided_slice %321 {offsets = [0, 256], sizes = [8, 128], strides = [1, 1]} : vector<8x512xf32> to vector<8x128xf32>
    %325 = vector.extract_strided_slice %321 {offsets = [0, 384], sizes = [8, 128], strides = [1, 1]} : vector<8x512xf32> to vector<8x128xf32>
    %326 = math.tanh %324 : vector<8x128xf32>
    %327 = arith.negf %325 : vector<8x128xf32>
    %328 = math.exp %327 : vector<8x128xf32>
    %cst_75 = arith.constant 1.000000e+00 : f32
    %329 = vector.broadcast %cst_75 : f32 to vector<8x128xf32>
    %330 = arith.addf %329, %328 : vector<8x128xf32>
    %331 = arith.divf %329, %330 : vector<8x128xf32>
    %332 = arith.addf %323, %315 : vector<8x128xf32>
    %333 = arith.maximumf %332, %322 : vector<8x128xf32>
    %334 = arith.subf %322, %333 : vector<8x128xf32>
    %335 = math.exp %334 : vector<8x128xf32>
    %336 = arith.addf %323, %315 : vector<8x128xf32>
    %337 = arith.subf %336, %333 : vector<8x128xf32>
    %338 = math.exp %337 : vector<8x128xf32>
    %339 = arith.mulf %338, %313 : vector<8x128xf32>
    %340 = arith.mulf %335, %326 : vector<8x128xf32>
    %341 = arith.addf %339, %340 : vector<8x128xf32>
    %342 = arith.mulf %338, %314 : vector<8x128xf32>
    %343 = arith.addf %342, %335 : vector<8x128xf32>
    %344 = arith.mulf %331, %341 : vector<8x128xf32>
    %cst_76 = arith.constant 9.99999997E-7 : f32
    %345 = vector.broadcast %cst_76 : f32 to vector<8x128xf32>
    %346 = arith.maximumf %343, %345 : vector<8x128xf32>
    %347 = tpu.reciprocal %346 {approx = true} : vector<8x128xf32> -> vector<8x128xf32>
    %348 = arith.mulf %344, %347 : vector<8x128xf32>
    %349 = arith.index_cast %c7_i32 : i32 to index
    %c0_77 = arith.constant 0 : index
    %c0_78 = arith.constant 0 : index
    %350 = vector.load %arg3[%349, %c0_77, %c0_78] : memref<8x8x128xf32, #tpu.memory_space<vmem>>, vector<1x8x128xf32>
    %351 = vector.shape_cast %350 : vector<1x8x128xf32> to vector<8x128xf32>
    %352 = vector.shape_cast %348 : vector<8x128xf32> to vector<1x8x128xf32>
    tpu.vector_store %arg3[%349, %c0_77, %c0_78], %352 {strides = array<i32>} : memref<8x8x128xf32, #tpu.memory_space<vmem>>, vector<1x8x128xf32>,
    %c8_i32_79 = arith.constant 8 : i32
    %353 = arith.muli %arg0, %c8_i32_79 : i32
    %354 = arith.addi %353, %c7_i32 : i32
    %c8_i32_80 = arith.constant 8 : i32
    %355 = arith.cmpi slt, %354, %c8_i32_80 : i32
    %356 = arith.select %355, %348, %312 : vector<8x128xf32>
    %357 = arith.select %355, %341, %313 : vector<8x128xf32>
    %358 = arith.select %355, %343, %314 : vector<8x128xf32>
    %359 = arith.select %355, %333, %315 : vector<8x128xf32>
    %c8_i32_81 = arith.constant 8 : i32
    %c0_82 = arith.constant 0 : index
    %c0_83 = arith.constant 0 : index
    %360 = vector.load %arg5[%c0_82, %c0_83] : memref<8x128xf32, #tpu.memory_space<vmem>>, vector<8x128xf32>
    tpu.vector_store %arg5[%c0_82, %c0_83], %356 {strides = array<i32>} : memref<8x128xf32, #tpu.memory_space<vmem>>, vector<8x128xf32>,
    %c0_84 = arith.constant 0 : index
    %c0_85 = arith.constant 0 : index
    %361 = vector.load %arg6[%c0_84, %c0_85] : memref<8x128xf32, #tpu.memory_space<vmem>>, vector<8x128xf32>
    tpu.vector_store %arg6[%c0_84, %c0_85], %357 {strides = array<i32>} : memref<8x128xf32, #tpu.memory_space<vmem>>, vector<8x128xf32>,
    %c0_86 = arith.constant 0 : index
    %c0_87 = arith.constant 0 : index
    %362 = vector.load %arg7[%c0_86, %c0_87] : memref<8x128xf32, #tpu.memory_space<vmem>>, vector<8x128xf32>
    tpu.vector_store %arg7[%c0_86, %c0_87], %358 {strides = array<i32>} : memref<8x128xf32, #tpu.memory_space<vmem>>, vector<8x128xf32>,
    %c0_88 = arith.constant 0 : index
    %c0_89 = arith.constant 0 : index
    %363 = vector.load %arg8[%c0_88, %c0_89] : memref<8x128xf32, #tpu.memory_space<vmem>>, vector<8x128xf32>
    tpu.vector_store %arg8[%c0_88, %c0_89], %359 {strides = array<i32>} : memref<8x128xf32, #tpu.memory_space<vmem>>, vector<8x128xf32>,
    %c0_90 = arith.constant 0 : index
    %c0_91 = arith.constant 0 : index
    %364 = vector.load %arg4[%c0_90, %c0_91] : memref<8x128xf32, #tpu.memory_space<vmem>>, vector<8x128xf32>
    tpu.vector_store %arg4[%c0_90, %c0_91], %357 {strides = array<i32>} : memref<8x128xf32, #tpu.memory_space<vmem>>, vector<8x128xf32>,
    return
  }
  func.func @transform_0(%arg0: i32) -> (i32, i32, i32) {
    %c0_i32 = arith.constant 0 : i32
    %c0_i32_0 = arith.constant 0 : i32
    %c0_i32_1 = arith.constant 0 : i32
    return %arg0, %c0_i32, %c0_i32_0 : i32, i32, i32
  }
  func.func @transform_1(%arg0: i32) -> (i32, i32) {
    %c0_i32 = arith.constant 0 : i32
    %c0_i32_0 = arith.constant 0 : i32
    %c0_i32_1 = arith.constant 0 : i32
    return %c0_i32, %c0_i32_0 : i32, i32
  }
  func.func @transform_2(%arg0: i32) -> (i32, i32, i32) {
    %c0_i32 = arith.constant 0 : i32
    %c0_i32_0 = arith.constant 0 : i32
    %c0_i32_1 = arith.constant 0 : i32
    return %arg0, %c0_i32, %c0_i32_0 : i32, i32, i32
  }
  func.func @transform_3(%arg0: i32) -> (i32, i32) {
    %c0_i32 = arith.constant 0 : i32
    %c0_i32_0 = arith.constant 0 : i32
    %c0_i32_1 = arith.constant 0 : i32
    return %c0_i32, %c0_i32_0 : i32, i32
  }
}

module attributes {stable_mosaic.version = 11 : i64} {
  func.func @_proj_norm_kernel(%arg0: i32, %arg1: memref<16x32xbf16, #tpu.memory_space<vmem>>, %arg2: memref<32x32xbf16, #tpu.memory_space<vmem>>, %arg3: memref<1x32xf32, #tpu.memory_space<vmem>>, %arg4: memref<16x32xf32, #tpu.memory_space<vmem>>, %arg5: memref<16x32xf32, #tpu.memory_space<vmem>>) attributes {dimension_semantics = [#tpu.dimension_semantics<parallel>], iteration_bounds = array<i64: 1>, scalar_prefetch = 0 : i64, scratch_operands = 0 : i64, tpu.core_type = #tpu.core_type<tc>, window_params = [{transform_indices = @transform_0, window_bounds = array<i64: 16, 32>}, {pipeline_mode = #tpu.pipeline_mode<synchronous>, transform_indices = @transform_1, window_bounds = array<i64: 32, 32>}, {pipeline_mode = #tpu.pipeline_mode<synchronous>, transform_indices = @transform_2, window_bounds = array<i64: 1, 32>}, {transform_indices = @transform_3, window_bounds = array<i64: 16, 32>}, {transform_indices = @transform_4, window_bounds = array<i64: 16, 32>}]} {
    %c0 = arith.constant 0 : index
    %c0_0 = arith.constant 0 : index
    %0 = vector.load %arg1[%c0, %c0_0] : memref<16x32xbf16, #tpu.memory_space<vmem>>, vector<16x32xbf16>
    %c0_1 = arith.constant 0 : index
    %c0_2 = arith.constant 0 : index
    %1 = vector.load %arg2[%c0_1, %c0_2] : memref<32x32xbf16, #tpu.memory_space<vmem>>, vector<32x32xbf16>
    %cst = arith.constant dense<0.000000e+00> : vector<16x32xf32>
    %2 = tpu.matmul %0, %1, %cst {dimension_numbers = #tpu.dot_dimension_numbers<[1], [0], [0], [1], [0, 0, 1, 1], [], []>} : vector<16x32xbf16>, vector<32x32xbf16>, vector<16x32xf32> -> vector<16x32xf32>
    %c0_3 = arith.constant 0 : index
    %c0_4 = arith.constant 0 : index
    %3 = vector.load %arg3[%c0_3, %c0_4] : memref<1x32xf32, #tpu.memory_space<vmem>>, vector<1x32xf32>
    %4 = vector.broadcast %3 : vector<1x32xf32> to vector<16x32xf32>
    %5 = arith.addf %2, %4 : vector<16x32xf32>
    %cst_5 = arith.constant 5.000000e-01 : f32
    %6 = vector.broadcast %cst_5 : f32 to vector<16x32xf32>
    %7 = arith.mulf %6, %5 : vector<16x32xf32>
    %cst_6 = arith.constant 4.471500e-02 : f32
    %8 = vector.broadcast %cst_6 : f32 to vector<16x32xf32>
    %9 = arith.mulf %8, %5 : vector<16x32xf32>
    %10 = arith.mulf %9, %5 : vector<16x32xf32>
    %11 = arith.mulf %10, %5 : vector<16x32xf32>
    %12 = arith.addf %5, %11 : vector<16x32xf32>
    %cst_7 = arith.constant 0.797884583 : f32
    %13 = vector.broadcast %cst_7 : f32 to vector<16x32xf32>
    %14 = arith.mulf %13, %12 : vector<16x32xf32>
    %15 = math.tanh %14 : vector<16x32xf32>
    %cst_8 = arith.constant 1.000000e+00 : f32
    %16 = vector.broadcast %cst_8 : f32 to vector<16x32xf32>
    %17 = arith.addf %16, %15 : vector<16x32xf32>
    %18 = arith.mulf %7, %17 : vector<16x32xf32>
    %c0_9 = arith.constant 0 : index
    %c0_10 = arith.constant 0 : index
    %19 = vector.load %arg4[%c0_9, %c0_10] : memref<16x32xf32, #tpu.memory_space<vmem>>, vector<16x32xf32>
    %20 = arith.addf %18, %19 : vector<16x32xf32>
    %cst_11 = arith.constant dense<0.000000e+00> : vector<16xf32>
    %21 = vector.multi_reduction <add>, %20, %cst_11 [1] : vector<16x32xf32> to vector<16xf32>
    %22 = vector.shape_cast %21 : vector<16xf32> to vector<16x1xf32>
    %cst_12 = arith.constant 3.200000e+01 : f32
    %23 = vector.broadcast %cst_12 : f32 to vector<16x1xf32>
    %24 = arith.divf %22, %23 : vector<16x1xf32>
    %25 = vector.broadcast %24 : vector<16x1xf32> to vector<16x32xf32>
    %26 = arith.subf %20, %25 : vector<16x32xf32>
    %27 = arith.mulf %26, %26 : vector<16x32xf32>
    %cst_13 = arith.constant dense<0.000000e+00> : vector<16xf32>
    %28 = vector.multi_reduction <add>, %27, %cst_13 [1] : vector<16x32xf32> to vector<16xf32>
    %29 = vector.shape_cast %28 : vector<16xf32> to vector<16x1xf32>
    %cst_14 = arith.constant 3.200000e+01 : f32
    %30 = vector.broadcast %cst_14 : f32 to vector<16x1xf32>
    %31 = arith.divf %29, %30 : vector<16x1xf32>
    %cst_15 = arith.constant 9.99999974E-6 : f32
    %32 = vector.broadcast %cst_15 : f32 to vector<16x1xf32>
    %33 = arith.addf %31, %32 : vector<16x1xf32>
    %34 = math.rsqrt %33 : vector<16x1xf32>
    %35 = vector.broadcast %34 : vector<16x1xf32> to vector<16x32xf32>
    %36 = arith.mulf %26, %35 : vector<16x32xf32>
    %c0_16 = arith.constant 0 : index
    %c0_17 = arith.constant 0 : index
    %37 = vector.load %arg5[%c0_16, %c0_17] : memref<16x32xf32, #tpu.memory_space<vmem>>, vector<16x32xf32>
    tpu.vector_store %arg5[%c0_16, %c0_17], %36 {strides = array<i32>} : memref<16x32xf32, #tpu.memory_space<vmem>>, vector<16x32xf32>,
    return
  }
  func.func @transform_0(%arg0: i32) -> (i32, i32) {
    %c0_i32 = arith.constant 0 : i32
    %c0_i32_0 = arith.constant 0 : i32
    return %arg0, %c0_i32 : i32, i32
  }
  func.func @transform_1(%arg0: i32) -> (i32, i32) {
    %c0_i32 = arith.constant 0 : i32
    %c0_i32_0 = arith.constant 0 : i32
    %c0_i32_1 = arith.constant 0 : i32
    return %c0_i32, %c0_i32_0 : i32, i32
  }
  func.func @transform_2(%arg0: i32) -> (i32, i32) {
    %c0_i32 = arith.constant 0 : i32
    %c0_i32_0 = arith.constant 0 : i32
    %c0_i32_1 = arith.constant 0 : i32
    return %c0_i32, %c0_i32_0 : i32, i32
  }
  func.func @transform_3(%arg0: i32) -> (i32, i32) {
    %c0_i32 = arith.constant 0 : i32
    %c0_i32_0 = arith.constant 0 : i32
    return %arg0, %c0_i32 : i32, i32
  }
  func.func @transform_4(%arg0: i32) -> (i32, i32) {
    %c0_i32 = arith.constant 0 : i32
    %c0_i32_0 = arith.constant 0 : i32
    return %arg0, %c0_i32 : i32, i32
  }
}

module attributes {stable_mosaic.version = 11 : i64} {
  func.func @_matmul_bias_kernel(%arg0: i32, %arg1: i32, %arg2: i32, %arg3: memref<16x128xbf16, #tpu.memory_space<vmem>>, %arg4: memref<128x128xbf16, #tpu.memory_space<vmem>>, %arg5: memref<1x128xf32, #tpu.memory_space<vmem>>, %arg6: memref<16x128xf32, #tpu.memory_space<vmem>>, %arg7: memref<16x128xf32, #tpu.memory_space<vmem>>) attributes {dimension_semantics = [#tpu.dimension_semantics<parallel>, #tpu.dimension_semantics<parallel>, #tpu.dimension_semantics<arbitrary>], iteration_bounds = array<i64: 1, 1, 1>, scalar_prefetch = 0 : i64, scratch_operands = 1 : i64, tpu.core_type = #tpu.core_type<tc>, window_params = [{transform_indices = @transform_0, window_bounds = array<i64: 16, 128>}, {transform_indices = @transform_1, window_bounds = array<i64: 128, 128>}, {transform_indices = @transform_2, window_bounds = array<i64: 1, 128>}, {transform_indices = @transform_3, window_bounds = array<i64: 16, 128>}]} {
    %c0_i32 = arith.constant 0 : i32
    %0 = arith.cmpi eq, %arg2, %c0_i32 : i32
    %1 = arith.extui %0 : i1 to i32
    %c0_i32_0 = arith.constant 0 : i32
    %2 = arith.cmpi ne, %1, %c0_i32_0 : i32
    scf.if %2 {
      %cst_10 = arith.constant 0.000000e+00 : f32
      %12 = vector.broadcast %cst_10 : f32 to vector<16x128xf32>
      %c0_11 = arith.constant 0 : index
      %c0_12 = arith.constant 0 : index
      %13 = vector.load %arg7[%c0_11, %c0_12] : memref<16x128xf32, #tpu.memory_space<vmem>>, vector<16x128xf32>
      tpu.vector_store %arg7[%c0_11, %c0_12], %12 {strides = array<i32>} : memref<16x128xf32, #tpu.memory_space<vmem>>, vector<16x128xf32>,
    } else {
    }
    %c0 = arith.constant 0 : index
    %c0_1 = arith.constant 0 : index
    %3 = vector.load %arg7[%c0, %c0_1] : memref<16x128xf32, #tpu.memory_space<vmem>>, vector<16x128xf32>
    %c0_2 = arith.constant 0 : index
    %c0_3 = arith.constant 0 : index
    %4 = vector.load %arg3[%c0_2, %c0_3] : memref<16x128xbf16, #tpu.memory_space<vmem>>, vector<16x128xbf16>
    %c0_4 = arith.constant 0 : index
    %c0_5 = arith.constant 0 : index
    %5 = vector.load %arg4[%c0_4, %c0_5] : memref<128x128xbf16, #tpu.memory_space<vmem>>, vector<128x128xbf16>
    %cst = arith.constant dense<0.000000e+00> : vector<16x128xf32>
    %6 = tpu.matmul %4, %5, %cst {dimension_numbers = #tpu.dot_dimension_numbers<[1], [0], [0], [1], [0, 0, 1, 1], [], []>} : vector<16x128xbf16>, vector<128x128xbf16>, vector<16x128xf32> -> vector<16x128xf32>
    %7 = arith.addf %3, %6 : vector<16x128xf32>
    %c0_6 = arith.constant 0 : index
    %c0_7 = arith.constant 0 : index
    %8 = vector.load %arg7[%c0_6, %c0_7] : memref<16x128xf32, #tpu.memory_space<vmem>>, vector<16x128xf32>
    tpu.vector_store %arg7[%c0_6, %c0_7], %7 {strides = array<i32>} : memref<16x128xf32, #tpu.memory_space<vmem>>, vector<16x128xf32>,
    %c0_i32_8 = arith.constant 0 : i32
    %9 = arith.cmpi eq, %arg2, %c0_i32_8 : i32
    %10 = arith.extui %9 : i1 to i32
    %c0_i32_9 = arith.constant 0 : i32
    %11 = arith.cmpi ne, %10, %c0_i32_9 : i32
    scf.if %11 {
      %c0_10 = arith.constant 0 : index
      %c0_11 = arith.constant 0 : index
      %12 = vector.load %arg7[%c0_10, %c0_11] : memref<16x128xf32, #tpu.memory_space<vmem>>, vector<16x128xf32>
      %c0_12 = arith.constant 0 : index
      %c0_13 = arith.constant 0 : index
      %13 = vector.load %arg5[%c0_12, %c0_13] : memref<1x128xf32, #tpu.memory_space<vmem>>, vector<1x128xf32>
      %14 = vector.broadcast %13 : vector<1x128xf32> to vector<16x128xf32>
      %15 = arith.addf %12, %14 : vector<16x128xf32>
      %c0_14 = arith.constant 0 : index
      %c0_15 = arith.constant 0 : index
      %16 = vector.load %arg6[%c0_14, %c0_15] : memref<16x128xf32, #tpu.memory_space<vmem>>, vector<16x128xf32>
      tpu.vector_store %arg6[%c0_14, %c0_15], %15 {strides = array<i32>} : memref<16x128xf32, #tpu.memory_space<vmem>>, vector<16x128xf32>,
    } else {
    }
    return
  }
  func.func @transform_0(%arg0: i32, %arg1: i32, %arg2: i32) -> (i32, i32) {
    %c0_i32 = arith.constant 0 : i32
    return %arg0, %arg2 : i32, i32
  }
  func.func @transform_1(%arg0: i32, %arg1: i32, %arg2: i32) -> (i32, i32) {
    %c0_i32 = arith.constant 0 : i32
    return %arg2, %arg1 : i32, i32
  }
  func.func @transform_2(%arg0: i32, %arg1: i32, %arg2: i32) -> (i32, i32) {
    %c0_i32 = arith.constant 0 : i32
    %c0_i32_0 = arith.constant 0 : i32
    return %c0_i32, %arg1 : i32, i32
  }
  func.func @transform_3(%arg0: i32, %arg1: i32, %arg2: i32) -> (i32, i32) {
    %c0_i32 = arith.constant 0 : i32
    return %arg0, %arg1 : i32, i32
  }
}

</mosaic_0001>

<bundles_post_ra>
// kernel: xlstm_forward.11
= control target key start
LH: loop header
LB: loop body
LE: loop exit
PB: predicated region body
PF: predicated region fallthrough
CT: control target
= control target key end

     0   :  { %s837_s12 = smov 0   ;;  %s839_s13 = smov 0   ;;  %s938_s0 = inlined_call_operand.vmem [shape: bf16[16,128], index: 0, kind: input, shape index: {}]   ;;  %s939_s1 = inlined_call_operand.vmem [shape: bf16[128,512], index: 1, kind: input, shape index: {}]   ;;  %s940_s2 = inlined_call_operand.vmem [shape: f32[1,512], index: 2, kind: input, shape index: {}]   ;;  %s941_s3 = inlined_call_operand.vmem [shape: f32[16,512], index: 3, kind: output, shape index: {}]  }
   0x1   :  { %s841_s14 = smov 0   ;;  %s843_s15 = smov 0  }
   0x2   :  { %s845_s16 = smov 0  }
   0x3 LB: > { %s28_s17 = sadd.s32 1, %s810_s15  ;;  %s674_s18 = sadd.s32 4294967295, %s814_s16   ;;  %s814_s16 = sphi %s845_s16, %s13_s16   ;;  %s810_s15 = sphi %s843_s15, %s946_s15   ;;  %s806_s14 = sphi %s841_s14, %s945_s14   ;;  %s802_s13 = sphi %s839_s13, %s944_s13   ;;  %s798_s12 = sphi %s837_s12, %s943_s12  }
   0x4   : > { %p30_p0 = scmp.ge.s32.totalorder %s28_s17, 2  ;;  %p76_p1 = scmp.ne.s32.totalorder %s802_s13, %s798_s12 }
   0x5   : > { %p77_p2 = scmp.eq.s32.totalorder %s814_s16, 0  ;;  %p134_p4 = scmp.eq.s32.totalorder %s674_s18, 1 }
   0x6   : > { %s948_s17 = smov (%p30_p0, %s28_s17), 0  ;;  %s69_s20 = sadd.s32 1, %s802_s13 }
   0x7   : > { %p78_p3 = por %p77_p2, %p76_p1  ;;  %s65_s19 = ssub.s32 %s810_s15, %s948_s17 }
   0x8   : > { %p67_p5 = scmp.eq.s32.totalorder %s65_s19, 0  ;;  %p872_p6 = por %p134_p4, %p76_p1 }
   0x9   : > { %p678_p7 = scmp.ge.s32.totalorder %s814_s16, 2 }
   0xa   : > { %s877_s22 = scalar_select %p67_p5, %s802_s13, %s69_s20  }
   0xb   : > { %168 = sbr.rel (%p678_p7) target bundleno = 30 (0x1e), region = 20 }
  0x12   : > { %171 = sbr.rel (!%p78_p3) target bundleno = 30 (0x1e), region = 24  ;;  %s173_s23 = sand.u32 (%p78_p3), 1, %s802_s13  }
  0x13   : > { %s708_s24 = sshll.u32 (%p78_p3), %s810_s15, 3  ;;  %s679_s25 = sshll.u32 (%p78_p3), %s173_s23, 7 }
  0x14   : > { %s885_s28 = scalar_lea.vmem (%p78_p3), %s939_s1, %s708_s24  ;;  %s175_s29 = scalar_lea.vmem (%p78_p3), [#allocation3], %s679_s25 }
  0x15   : > { %v239_v0 = vld [vmem:[%s885_s28] sm:$0xff] (%p78_p3)  ;;  %v241_v1 = vld [vmem:[%s885_s28 + $0x10] sm:$0xff] (%p78_p3) }
  0x16   : > { %v243_v2 = vld [vmem:[%s885_s28 + $0x20] sm:$0xff] (%p78_p3)  ;;  %240 = vst [vmem:[%s175_s29] sm:$0xff] (%p78_p3), %v239_v0  ;;  %242 = vst [vmem:[%s175_s29 + $0x8] sm:$0xff] (%p78_p3), %v241_v1  ;;  %v245_v3 = vld [vmem:[%s885_s28 + $0x30] sm:$0xff] (%p78_p3) }
  0x17   : > { %244 = vst [vmem:[%s175_s29 + $0x10] sm:$0xff] (%p78_p3), %v243_v2  ;;  %v247_v4 = vld [vmem:[%s885_s28 + $0x40] sm:$0xff] (%p78_p3)  ;;  %v249_v5 = vld [vmem:[%s885_s28 + $0x50] sm:$0xff] (%p78_p3)  ;;  %246 = vst [vmem:[%s175_s29 + $0x18] sm:$0xff] (%p78_p3), %v245_v3 }
  0x18   : > { %248 = vst [vmem:[%s175_s29 + $0x20] sm:$0xff] (%p78_p3), %v247_v4  ;;  %250 = vst [vmem:[%s175_s29 + $0x28] sm:$0xff] (%p78_p3), %v249_v5  ;;  %v251_v6 = vld [vmem:[%s885_s28 + $0x60] sm:$0xff] (%p78_p3)  ;;  %v253_v7 = vld [vmem:[%s885_s28 + $0x70] sm:$0xff] (%p78_p3) }
  0x19   : > { %v255_v8 = vld [vmem:[%s885_s28 + $0x80] sm:$0xff]  ;;  %252 = vst [vmem:[%s175_s29 + $0x30] sm:$0xff] %v251_v6  ;;  %254 = vst [vmem:[%s175_s29 + $0x38] sm:$0xff] %v253_v7  ;;  %v257_v9 = vld [vmem:[%s885_s28 + $0x90] sm:$0xff] }
  0x1a   : > { %256 = vst [vmem:[%s175_s29 + $0x40] sm:$0xff] %v255_v8  ;;  %v259_v10 = vld [vmem:[%s885_s28 + $0xa0] sm:$0xff]  ;;  %v261_v11 = vld [vmem:[%s885_s28 + $0xb0] sm:$0xff]  ;;  %258 = vst [vmem:[%s175_s29 + $0x48] sm:$0xff] %v257_v9 }
  0x1b   : > { %260 = vst [vmem:[%s175_s29 + $0x50] sm:$0xff] %v259_v10  ;;  %262 = vst [vmem:[%s175_s29 + $0x58] sm:$0xff] %v261_v11  ;;  %v263_v12 = vld [vmem:[%s885_s28 + $0xc0] sm:$0xff]  ;;  %v265_v13 = vld [vmem:[%s885_s28 + $0xd0] sm:$0xff] }
  0x1c   : > { %v267_v14 = vld [vmem:[%s885_s28 + $0xe0] sm:$0xff]  ;;  %264 = vst [vmem:[%s175_s29 + $0x60] sm:$0xff] %v263_v12  ;;  %266 = vst [vmem:[%s175_s29 + $0x68] sm:$0xff] %v265_v13  ;;  %v269_v15 = vld [vmem:[%s885_s28 + $0xf0] sm:$0xff] }
  0x1d   : > { %268 = vst [vmem:[%s175_s29 + $0x70] sm:$0xff] %v267_v14  ;;  %270 = vst [vmem:[%s175_s29 + $0x78] sm:$0xff] %v269_v15 }
  0x1e PF: > { %p682_p8 = scmp.ge.s32.totalorder %s814_s16, 1  ;;  %p283_p9 = scmp.lt.s32.totalorder %s814_s16, 3 }
  0x20   : > { %p284_p10 = pnand %p682_p8, %p283_p9 }
  0x21   : > { %s290_s30 = sand.u32 (!%p284_p10), 1, %s798_s12   ;;  %v816_v16 = vmov (!%p284_p10), 0   ;;  %v775_v33 = vld [vmem:[%s938_s0] sm:$0xff] (!%p284_p10)   ;;  %s685_s8 = sshll.u32 (!%p284_p10), %s806_s14, 1  ;;  %v519_v34 = vlaneseq (!%p284_p10) }
  0x22   : > { %287 = sbr.rel (%p284_p10) target bundleno = 295 (0x127), region = 66  ;;  %s683_s4 = sshll.u32 (!%p284_p10), %s290_s30, 7  ;;  %491 = vmatprep.mubr.bf16.mxu0 (!%p284_p10), %v816_v16 }
  0x23   : > { %s292_s5 = scalar_lea.vmem (!%p284_p10), [#allocation3], %s683_s4  ;;  %p336_p11 = scmp.lt.s32.totalorder (!%p284_p10), %s685_s8, 3  ;;  %v520_v35 = vshrl.u32 (!%p284_p10), %v519_v34, 7 }
  0x24   : > { %v751_v17 = vld [vmem:[%s292_s5 + $0x4] ss:$8 sps:$4 sm:$0xff] (!%p284_p10)   ;;  %v753_v18 = vld [vmem:[%s292_s5] ss:$8 sps:$4 sm:$0xff] (!%p284_p10)   ;;  %v754_v19 = vld [vmem:[%s292_s5 + $0x14] ss:$8 sps:$4 sm:$0xff] (!%p284_p10)  }
  0x25   : > { %459 = vmatprep.subr.bf16.mxu0 (!%p284_p10), %v751_v17  ;;  %v756_v20 = vld [vmem:[%s292_s5 + $0x10] ss:$8 sps:$4 sm:$0xff] (!%p284_p10)   ;;  %v757_v21 = vld [vmem:[%s292_s5 + $0x24] ss:$8 sps:$4 sm:$0xff] (!%p284_p10)   ;;  %v759_v22 = vld [vmem:[%s292_s5 + $0x20] ss:$8 sps:$4 sm:$0xff] (!%p284_p10)  }
  0x26   : > { %460 = vmatpush1.bf16.msra.mxu0 (!%p284_p10), %v753_v18  ;;  %v760_v23 = vld [vmem:[%s292_s5 + $0x34] ss:$8 sps:$4 sm:$0xff] (!%p284_p10)   ;;  %v762_v24 = vld [vmem:[%s292_s5 + $0x30] ss:$8 sps:$4 sm:$0xff] (!%p284_p10)   ;;  %v763_v25 = vld [vmem:[%s292_s5 + $0x44] ss:$8 sps:$4 sm:$0xff] (!%p284_p10)  }
  0x27   : > { %461 = vmatprep.subr.bf16.mxu0 (!%p284_p10), %v754_v19  ;;  %v765_v26 = vld [vmem:[%s292_s5 + $0x40] ss:$8 sps:$4 sm:$0xff] (!%p284_p10)   ;;  %v766_v27 = vld [vmem:[%s292_s5 + $0x54] ss:$8 sps:$4 sm:$0xff] (!%p284_p10)   ;;  %v768_v28 = vld [vmem:[%s292_s5 + $0x50] ss:$8 sps:$4 sm:$0xff] (!%p284_p10)  }
  0x28   : > { %v769_v29 = vld [vmem:[%s292_s5 + $0x64] ss:$8 sps:$4 sm:$0xff] (!%p284_p10)   ;;  %v771_v30 = vld [vmem:[%s292_s5 + $0x60] ss:$8 sps:$4 sm:$0xff] (!%p284_p10)   ;;  %v772_v31 = vld [vmem:[%s292_s5 + $0x74] ss:$8 sps:$4 sm:$0xff] (!%p284_p10)  }
  0x29   : > { %v774_v32 = vld [vmem:[%s292_s5 + $0x70] ss:$8 sps:$4 sm:$0xff]   ;;  %s950_s8 = smov (!%p336_p11, %s685_s8), 3  ;;  %v521_v36 = vsub.s32 0, %v520_v35  ;;  %v525_v38 = vsub.s32 1, %v520_v35  ;;  %s684_s18 = sshll.u32 %s290_s30, 5 }
  0x2a   : > { %462 = vmatpush1.bf16.msra.mxu0 %v756_v20  ;;  %s338_s11 = scalar_lea.vmem %s940_s2, %s950_s8  ;;  %s323_s19 = scalar_lea.vmem [#allocation4], %s684_s18 }
  0x2b   : > { %463 = vmatprep.subr.bf16.mxu0 %v757_v21  ;;  %v517_v37 = vld [vmem:[%s338_s11] sm:$0x3]  ;;  %s709_s12 = sshll.u32 (%p872_p6), %s806_s14, 4 }
  0x2c   : > { %v522_v39 = vrot.slane %v517_v37, %v521_v36  ;;  %v526_v40 = vrot.slane %v517_v37, %v525_v38  ;;  %s549_s24 = scalar_lea.vmem (%p872_p6), %s941_s3, %s709_s12 }
  0x2e   : > { %464 = vmatpush1.bf16.msra.mxu0 %v759_v22 }
  0x2f   : > { %465 = vmatprep.subr.bf16.mxu0 %v760_v23 }
  0x32   : > { %466 = vmatpush1.bf16.msra.mxu0 %v762_v24 }
  0x33   : > { %467 = vmatprep.subr.bf16.mxu0 %v763_v25 }
  0x36   : > { %468 = vmatpush1.bf16.msra.mxu0 %v765_v26 }
  0x37   : > { %469 = vmatprep.subr.bf16.mxu0 %v766_v27 }
  0x3a   : > { %470 = vmatpush1.bf16.msra.mxu0 %v768_v28 }
  0x3b   : > { %471 = vmatprep.subr.bf16.mxu0 %v769_v29 }
  0x3e   : > { %472 = vmatpush1.bf16.msra.mxu0 %v771_v30 }
  0x3f   : > { %473 = vmatprep.subr.bf16.mxu0 %v772_v31 }
  0x42   : > { %474 = vmatpush1.bf16.msra.mxu0 %v774_v32 }
  0x45   : > { %492 = vmatmul.mubr.bf16.vlgmr.msra.gmra.mrb[0].mxu0 %v775_v33 }
 0x118   : > { %v493_v41 = vpop.f32.mrb[0].mxu0  ;;  %543 = sbr.rel (!%p872_p6) target bundleno = 295 (0x127), region = 82 }
 0x119   : > { %v529_v42 = vadd.f32 %v522_v39, %v493_v41  ;;  %v495_v43 = vpop.f32.mrb[1].mxu0 }
 0x11a   : > { %v530_v44 = vadd.f32 %v526_v40, %v495_v43  ;;  %v497_v45 = vpop.f32.mrb[2].mxu0 }
 0x11b   : > { %533 = vst [vmem:[%s323_s19] sm:$0xff] %v529_v42  ;;  %v531_v46 = vadd.f32 %v522_v39, %v497_v45  ;;  %v499_v47 = vpop.f32.mrb[3].mxu0 }
 0x11c   : > { %534 = vst [vmem:[%s323_s19 + $0x8] sm:$0xff] %v530_v44  ;;  %v532_v48 = vadd.f32 %v526_v40, %v499_v47 }
 0x11d   : > { %535 = vst [vmem:[%s323_s19 + $0x10] sm:$0xff] %v531_v46 }
 0x11e   : > { %536 = vst [vmem:[%s323_s19 + $0x18] sm:$0xff] %v532_v48 }
 0x122   : > { %v562_v49 = vld [vmem:[%s323_s19] sm:$0xff] }
 0x123   : > { %v564_v50 = vld [vmem:[%s323_s19 + $0x8] sm:$0xff]  ;;  %563 = vst [vmem:[%s549_s24] sm:$0xff] %v562_v49 }
 0x124   : > { %v566_v51 = vld [vmem:[%s323_s19 + $0x10] sm:$0xff]  ;;  %565 = vst [vmem:[%s549_s24 + $0x8] sm:$0xff] %v564_v50 }
 0x125   : > { %v568_v52 = vld [vmem:[%s323_s19 + $0x18] sm:$0xff]  ;;  %567 = vst [vmem:[%s549_s24 + $0x20] sm:$0xff] %v566_v51 }
 0x126   : > { %569 = vst [vmem:[%s549_s24 + $0x28] sm:$0xff] %v568_v52 }
 0x127 PF: > { %s13_s16 = sadd.s32 1, %s814_s16   ;;  %s943_s12 = smov %s802_s13 }
 0x128   : > { %p10_p12 = scmp.ge.s32.totalorder %s13_s16, 4   ;;  %s944_s13 = smov %s877_s22 }
 0x129   : > { %s945_s14 = smov %s810_s15  ;;  %s946_s15 = smov %s948_s17 }
 0x12a   :  { %12 = sbr.rel (!%p10_p12) target bundleno = 3 (0x3), region = 142 }

// kernel: xlstm_forward.15
= control target key start
LH: loop header
LB: loop body
LE: loop exit
PB: predicated region body
PF: predicated region fallthrough
CT: control target
= control target key end

     0   :  { %v177_v0 = vmov 0.0   ;;  %vm178_vm0 = vmmov 0   ;;  %vm48_vm1 = vcmask 261120   ;;  %s235_s1 = inlined_call_operand.vmem [shape: bf16[32,32], index: 1, kind: input, shape index: {}]   ;;  %s236_s0 = inlined_call_operand.vmem [shape: bf16[16,32], index: 0, kind: input, shape index: {}]   ;;  %s237_s2 = inlined_call_operand.vmem [shape: f32[1,32], index: 2, kind: input, shape index: {}]   ;;  %s238_s3 = inlined_call_operand.vmem [shape: f32[16,32], index: 3, kind: input, shape index: {}]   ;;  %s239_s4 = inlined_call_operand.vmem [shape: f32[16,32], index: 4, kind: output, shape index: {}]  }
   0x1   :  { %156 = vmatprep.subr.bf16.mxu0 %v177_v0  ;;  %v166_v1 = vld [vmem:[%s235_s1] sm:$0xff]   ;;  %160 = vmatprep.mubr.msk.bf16.mxu0 %vm178_vm0, %v177_v0  ;;  %v167_v2 = vld [vmem:[%s235_s1 + $0x8] sm:$0xff]  }
   0x2   :  { %157 = vmatpush3.bf16.msra.mxu0 %v166_v1  ;;  %v168_v3 = vld [vmem:[%s236_s0] sm:$0xff]   ;;  %v112_v29 = vld [vmem:[%s238_s3 + $0x8] sm:$0xff] }
   0x3   :  { %158 = vmatprep.subr.bf16.mxu0 %v177_v0  ;;  %v148_v4 = vld [vmem:[%s237_s2] ss:$0 sm:$0xff] }
   0x4   :  { %v111_v25 = vld [vmem:[%s238_s3] sm:$0xff] }
   0x6   :  { %159 = vmatpush3.bf16.msra.mxu0 %v167_v2 }
   0x9   :  { %161 = vmatmul.mubr.msk.bf16.vlgmr.msra.gmra.mrb[0].mxu0 %vm48_vm1, %v168_v3 }
  0xdc   :  { %v86_v5 = vpop.f32.mrb[0].mxu0 }
  0xdd   :  { %v87_v6 = vadd.f32 %v148_v4, %v86_v5  ;;  %v162_v7 = vpop.f32.mrb[1].mxu0 }
  0xde   :  { %v89_v8 = vpop.f32.mrb[2].mxu0 }
  0xdf   :  { %v95_v9 = vmul.f32 0.044715, %v87_v6  ;;  %v90_v10 = vadd.f32 %v148_v4, %v89_v8  ;;  %v163_v11 = vpop.f32.mrb[3].mxu0  ;;  %v93_v22 = vmul.f32 0.5, %v87_v6 }
  0xe1   :  { %v97_v12 = vmul.f32 %v95_v9, %v87_v6  ;;  %v96_v13 = vmul.f32 0.044715, %v90_v10  ;;  %v94_v27 = vmul.f32 0.5, %v90_v10 }
  0xe3   :  { %v98_v14 = vmul.f32 %v96_v13, %v90_v10  ;;  %v99_v15 = vmul.f32 %v97_v12, %v87_v6 }
  0xe5   :  { %v101_v16 = vadd.f32 %v99_v15, %v87_v6  ;;  %v100_v17 = vmul.f32 %v98_v14, %v90_v10 }
  0xe7   :  { %v103_v18 = vmul.f32 0.7978846, %v101_v16  ;;  %v102_v19 = vadd.f32 %v100_v17, %v90_v10 }
  0xe9   :  { %169 = vtanh.f32 %v103_v18  ;;  %v104_v20 = vmul.f32 0.7978846, %v102_v19 }
  0xeb   :  { %171 = vtanh.f32 %v104_v20 }
  0xf3   :  { %v170_v21 = vpop.eup %169 }
  0xf4   :  { %v107_v23 = vadd.f32 1.0, %v170_v21 }
  0xf5   :  { %v172_v24 = vpop.eup %171 }
  0xf6   :  { %v109_v26 = vmul.f32 %v107_v23, %v93_v22  ;;  %v108_v28 = vadd.f32 1.0, %v172_v24 }
  0xf8   :  { %v113_v30 = vadd.f32 %v111_v25, %v109_v26  ;;  %v110_v31 = vmul.f32 %v108_v28, %v94_v27 }
  0xfa   :  { %v115_v32 = vsel %vm48_vm1, %v113_v30, 0.0  ;;  %v114_v33 = vadd.f32 %v112_v29, %v110_v31 }
  0xfb   :  { %116 = vadd.xlane.f32.xlu0 %v115_v32 }
  0xfc   :  { %v118_v34 = vsel %vm48_vm1, %v114_v33, 0.0 }
  0xff   :  { %119 = vadd.xlane.f32.xlu0 %v118_v34 }
 0x188   :  { %v117_v35 = vpop.xlane.xlu0 %116 }
 0x189   :  { %v122_v36 = vmul.f32 0.03125, %v117_v35 }
 0x18b   :  { %v124_v37 = vsub.f32 %v113_v30, %v122_v36 }
 0x18c   :  { %v120_v38 = vpop.xlane.xlu0 %119 }
 0x18d   :  { %v123_v39 = vmul.f32 0.03125, %v120_v38  ;;  %v126_v40 = vmul.f32 %v124_v37, %v124_v37 }
 0x18f   :  { %v125_v41 = vsub.f32 %v114_v33, %v123_v39  ;;  %v128_v42 = vsel %vm48_vm1, %v126_v40, 0.0 }
 0x190   :  { %129 = vadd.xlane.f32.xlu1 %v128_v42 }
 0x191   :  { %v127_v43 = vmul.f32 %v125_v41, %v125_v41 }
 0x193   :  { %v131_v44 = vsel %vm48_vm1, %v127_v43, 0.0 }
 0x194   :  { %132 = vadd.xlane.f32.xlu1 %v131_v44 }
 0x21d   :  { %v130_v45 = vpop.xlane.xlu1 %129 }
 0x21e   :  { %v134_v46 = vmul.f32 0.03125, %v130_v45 }
 0x220   :  { %v136_v47 = vadd.f32 1e-05, %v134_v46 }
 0x221   :  { %v133_v48 = vpop.xlane.xlu1 %132 }
 0x222   :  { %173 = vrsqrt.f32 %v136_v47  ;;  %v135_v49 = vmul.f32 0.03125, %v133_v48 }
 0x224   :  { %v137_v50 = vadd.f32 1e-05, %v135_v49 }
 0x226   :  { %175 = vrsqrt.f32 %v137_v50 }
 0x22c   :  { %v174_v51 = vpop.eup %173 }
 0x22d   :  { %v140_v52 = vmul.f32 %v174_v51, %v124_v37 }
 0x22f   :  { %142 = vst.msk [vmem:[%s239_s4] sm:$0xff] %vm48_vm1, %v140_v52 }
 0x230   :  { %v176_v53 = vpop.eup %175 }
 0x231   :  { %v141_v54 = vmul.f32 %v176_v53, %v125_v41 }
 0x233   :  { %143 = vst.msk [vmem:[%s239_s4 + $0x8] sm:$0xff] %vm48_vm1, %v141_v54 }

// kernel: xlstm_forward.21
= control target key start
LH: loop header
LB: loop body
LE: loop exit
PB: predicated region body
PF: predicated region fallthrough
CT: control target
= control target key end

     0   :  { %v210_v0 = vmov 0.0   ;;  %vm211_vm0 = vmmov 0   ;;  %s268_s1 = inlined_call_operand.vmem [shape: bf16[128,128], index: 1, kind: input, shape index: {}]   ;;  %s269_s0 = inlined_call_operand.vmem [shape: bf16[16,128], index: 0, kind: input, shape index: {}]   ;;  %s270_s2 = inlined_call_operand.vmem [shape: f32[1,128], index: 2, kind: input, shape index: {}]   ;;  %s271_s3 = inlined_call_operand.vmem [shape: f32[16,128], index: 3, kind: output, shape index: {}]  }
   0x1   :  { %179 = vmatprep.subr.bf16.mxu0 %v210_v0  ;;  %v201_v1 = vld [vmem:[%s268_s1] sm:$0xff]   ;;  %195 = vmatprep.mubr.msk.bf16.mxu0 %vm211_vm0, %v210_v0  ;;  %v202_v2 = vld [vmem:[%s268_s1 + $0x8] sm:$0xff]   ;;  %v203_v3 = vld [vmem:[%s268_s1 + $0x10] sm:$0xff]  }
   0x2   :  { %180 = vmatpush3.bf16.msra.mxu0 %v201_v1  ;;  %v204_v4 = vld [vmem:[%s268_s1 + $0x18] sm:$0xff]   ;;  %v205_v5 = vld [vmem:[%s268_s1 + $0x20] sm:$0xff]   ;;  %v206_v6 = vld [vmem:[%s268_s1 + $0x28] sm:$0xff]  }
   0x3   :  { %181 = vmatprep.subr.bf16.mxu0 %v210_v0  ;;  %v207_v7 = vld [vmem:[%s268_s1 + $0x30] sm:$0xff]   ;;  %v208_v8 = vld [vmem:[%s268_s1 + $0x38] sm:$0xff]   ;;  %v209_v9 = vld [vmem:[%s269_s0] sm:$0xff]  }
   0x4   :  { %v169_v10 = vld [vmem:[%s270_s2] ss:$0 sm:$0xff] }
   0x6   :  { %182 = vmatpush3.bf16.msra.mxu0 %v202_v2 }
   0x7   :  { %183 = vmatprep.subr.bf16.mxu0 %v210_v0 }
   0xa   :  { %184 = vmatpush3.bf16.msra.mxu0 %v203_v3 }
   0xb   :  { %185 = vmatprep.subr.bf16.mxu0 %v210_v0 }
   0xe   :  { %186 = vmatpush3.bf16.msra.mxu0 %v204_v4 }
   0xf   :  { %187 = vmatprep.subr.bf16.mxu0 %v210_v0 }
  0x12   :  { %188 = vmatpush3.bf16.msra.mxu0 %v205_v5 }
  0x13   :  { %189 = vmatprep.subr.bf16.mxu0 %v210_v0 }
  0x16   :  { %190 = vmatpush3.bf16.msra.mxu0 %v206_v6 }
  0x17   :  { %191 = vmatprep.subr.bf16.mxu0 %v210_v0 }
  0x1a   :  { %192 = vmatpush3.bf16.msra.mxu0 %v207_v7 }
  0x1b   :  { %193 = vmatprep.subr.bf16.mxu0 %v210_v0 }
  0x1e   :  { %194 = vmatpush3.bf16.msra.mxu0 %v208_v8 }
  0x21   :  { %196 = vmatmul.mubr.bf16.vlgmr.msra.gmra.mrb[0].mxu0 %v209_v9 }
  0xf4   :  { %v129_v11 = vpop.f32.mrb[0].mxu0 }
  0xf5   :  { %v152_v12 = vadd.f32 %v169_v10, %v129_v11  ;;  %v197_v13 = vpop.f32.mrb[1].mxu0 }
  0xf6   :  { %v132_v14 = vpop.f32.mrb[2].mxu0 }
  0xf7   :  { %154 = vst [vmem:[%s271_s3] sm:$0xff] %v152_v12  ;;  %v153_v15 = vadd.f32 %v169_v10, %v132_v14  ;;  %v198_v16 = vpop.f32.mrb[3].mxu0 }
  0xf9   :  { %155 = vst [vmem:[%s271_s3 + $0x8] sm:$0xff] %v153_v15 }

// kernel: xlstm_forward.12
= control target key start
LH: loop header
LB: loop body
LE: loop exit
PB: predicated region body
PF: predicated region fallthrough
CT: control target
= control target key end

     0   :  { %v1498_v1 = vmov 0   ;;  %v1499_v33 = vmov 0.0|0.0   ;;  %s2217_s1 = inlined_call_operand.vmem [shape: bf16[128,512], index: 1, kind: input, shape index: {}]   ;;  %s2218_s0 = inlined_call_operand.vmem [shape: f32[8,8,512], index: 0, kind: input, shape index: {}]   ;;  %s2219_s2 = inlined_call_operand.vmem [shape: f32[8,8,128], index: 2, kind: output, shape index: {0}]   ;;  %s2220_s3 = inlined_call_operand.vmem [shape: f32[8,128], index: 3, kind: output, shape index: {1}]  }
   0x1   :  { %v1523_v0 = vld [vmem:[%s2217_s1 + $0x4] ss:$16 sps:$4 sm:$0xff]   ;;  %255 = vmatprep.mubr.bf16.mxu0 %v1498_v1  ;;  %296 = vmatprep.mubr.bf16.mxu1 %v1498_v1  ;;  %v1530_v2 = vld [vmem:[%s2217_s1 + $0xc] ss:$16 sps:$4 sm:$0xff]   ;;  %v1536_v3 = vld [vmem:[%s2217_s1] ss:$16 sps:$4 sm:$0xff]  }
   0x2   :  { %223 = vmatprep.subr.bf16.mxu0 %v1523_v0  ;;  %v1541_v4 = vld [vmem:[%s2217_s1 + $0x8] ss:$16 sps:$4 sm:$0xff]   ;;  %264 = vmatprep.subr.bf16.mxu1 %v1530_v2  ;;  %v1547_v5 = vld [vmem:[%s2217_s1 + $0x24] ss:$16 sps:$4 sm:$0xff]   ;;  %v1554_v6 = vld [vmem:[%s2217_s1 + $0x2c] ss:$16 sps:$4 sm:$0xff]  }
   0x3   :  { %224 = vmatpush1.bf16.msra.mxu0 %v1536_v3  ;;  %265 = vmatpush1.bf16.msra.mxu1 %v1541_v4  ;;  %v1559_v7 = vld [vmem:[%s2217_s1 + $0x20] ss:$16 sps:$4 sm:$0xff]   ;;  %v1565_v8 = vld [vmem:[%s2217_s1 + $0x28] ss:$16 sps:$4 sm:$0xff]   ;;  %v1571_v9 = vld [vmem:[%s2217_s1 + $0x44] ss:$16 sps:$4 sm:$0xff]  }
   0x4   :  { %225 = vmatprep.subr.bf16.mxu0 %v1547_v5  ;;  %266 = vmatprep.subr.bf16.mxu1 %v1554_v6  ;;  %v1576_v10 = vld [vmem:[%s2217_s1 + $0x4c] ss:$16 sps:$4 sm:$0xff]   ;;  %v1581_v11 = vld [vmem:[%s2217_s1 + $0x40] ss:$16 sps:$4 sm:$0xff]   ;;  %v1586_v12 = vld [vmem:[%s2217_s1 + $0x48] ss:$16 sps:$4 sm:$0xff]  }
   0x5   :  { %v1593_v13 = vld [vmem:[%s2217_s1 + $0x64] ss:$16 sps:$4 sm:$0xff]   ;;  %v1600_v14 = vld [vmem:[%s2217_s1 + $0x6c] ss:$16 sps:$4 sm:$0xff]   ;;  %v1605_v15 = vld [vmem:[%s2217_s1 + $0x60] ss:$16 sps:$4 sm:$0xff]  }
   0x6   :  { %v1612_v16 = vld [vmem:[%s2217_s1 + $0x68] ss:$16 sps:$4 sm:$0xff]   ;;  %v1617_v17 = vld [vmem:[%s2217_s1 + $0x84] ss:$16 sps:$4 sm:$0xff]   ;;  %v1624_v18 = vld [vmem:[%s2217_s1 + $0x8c] ss:$16 sps:$4 sm:$0xff]  }
   0x7   :  { %226 = vmatpush1.bf16.msra.mxu0 %v1559_v7  ;;  %267 = vmatpush1.bf16.msra.mxu1 %v1565_v8  ;;  %v1629_v19 = vld [vmem:[%s2217_s1 + $0x80] ss:$16 sps:$4 sm:$0xff]   ;;  %v1634_v20 = vld [vmem:[%s2217_s1 + $0x88] ss:$16 sps:$4 sm:$0xff]   ;;  %v1641_v21 = vld [vmem:[%s2217_s1 + $0xa4] ss:$16 sps:$4 sm:$0xff]  }
   0x8   :  { %227 = vmatprep.subr.bf16.mxu0 %v1571_v9  ;;  %268 = vmatprep.subr.bf16.mxu1 %v1576_v10  ;;  %v1648_v22 = vld [vmem:[%s2217_s1 + $0xac] ss:$16 sps:$4 sm:$0xff]   ;;  %v1655_v23 = vld [vmem:[%s2217_s1 + $0xa0] ss:$16 sps:$4 sm:$0xff]   ;;  %v1660_v24 = vld [vmem:[%s2217_s1 + $0xa8] ss:$16 sps:$4 sm:$0xff]  }
   0x9   :  { %v1667_v25 = vld [vmem:[%s2217_s1 + $0xc4] ss:$16 sps:$4 sm:$0xff]   ;;  %v1672_v26 = vld [vmem:[%s2217_s1 + $0xcc] ss:$16 sps:$4 sm:$0xff]   ;;  %v1679_v27 = vld [vmem:[%s2217_s1 + $0xc0] ss:$16 sps:$4 sm:$0xff]  }
   0xa   :  { %v1684_v28 = vld [vmem:[%s2217_s1 + $0xc8] ss:$16 sps:$4 sm:$0xff]   ;;  %v1691_v29 = vld [vmem:[%s2217_s1 + $0xe4] ss:$16 sps:$4 sm:$0xff]   ;;  %v1696_v30 = vld [vmem:[%s2217_s1 + $0xec] ss:$16 sps:$4 sm:$0xff]  }
   0xb   :  { %228 = vmatpush1.bf16.msra.mxu0 %v1581_v11  ;;  %269 = vmatpush1.bf16.msra.mxu1 %v1586_v12  ;;  %v1703_v31 = vld [vmem:[%s2217_s1 + $0xe0] ss:$16 sps:$4 sm:$0xff]   ;;  %v1708_v32 = vld [vmem:[%s2217_s1 + $0xe8] ss:$16 sps:$4 sm:$0xff]  }
   0xc   :  { %229 = vmatprep.subr.bf16.mxu0 %v1593_v13  ;;  %270 = vmatprep.subr.bf16.mxu1 %v1600_v14  ;;  %v58_v34 = vld [vmem:[%s2218_s0] sm:$0xff]  ;;  %v59_v35 = vld [vmem:[%s2218_s0 + $0x8] sm:$0xff]  ;;  %v61_v36 = vld [vmem:[%s2218_s0 + $0x18] sm:$0xff] }
   0xd   :  { %v60_v40 = vld [vmem:[%s2218_s0 + $0x10] sm:$0xff] }
   0xf   :  { %230 = vmatpush1.bf16.msra.mxu0 %v1605_v15  ;;  %271 = vmatpush1.bf16.msra.mxu1 %v1612_v16 }
  0x10   :  { %231 = vmatprep.subr.bf16.mxu0 %v1617_v17  ;;  %272 = vmatprep.subr.bf16.mxu1 %v1624_v18 }
  0x13   :  { %232 = vmatpush1.bf16.msra.mxu0 %v1629_v19  ;;  %273 = vmatpush1.bf16.msra.mxu1 %v1634_v20 }
  0x14   :  { %233 = vmatprep.subr.bf16.mxu0 %v1641_v21  ;;  %274 = vmatprep.subr.bf16.mxu1 %v1648_v22 }
  0x17   :  { %234 = vmatpush1.bf16.msra.mxu0 %v1655_v23  ;;  %275 = vmatpush1.bf16.msra.mxu1 %v1660_v24 }
  0x18   :  { %235 = vmatprep.subr.bf16.mxu0 %v1667_v25  ;;  %276 = vmatprep.subr.bf16.mxu1 %v1672_v26 }
  0x1b   :  { %236 = vmatpush1.bf16.msra.mxu0 %v1679_v27  ;;  %277 = vmatpush1.bf16.msra.mxu1 %v1684_v28 }
  0x1c   :  { %237 = vmatprep.subr.bf16.mxu0 %v1691_v29  ;;  %278 = vmatprep.subr.bf16.mxu1 %v1696_v30 }
  0x1f   :  { %238 = vmatpush1.bf16.msra.mxu0 %v1703_v31  ;;  %279 = vmatpush1.bf16.msra.mxu1 %v1708_v32 }
  0x20   :  { %349 = vmatprep.subr.bf16.mxu0 %v1523_v0  ;;  %390 = vmatprep.subr.bf16.mxu1 %v1530_v2 }
  0x22   :  { %256 = vmatmul.mubr.bf16.vlgmr.msra.gmra.mrb[0].mxu0 %v1499_v33  ;;  %297 = vmatmul.mubr.bf16.vlgmr.msra.gmra.mrb[0].mxu1 %v1499_v33 }
  0x23   :  { %350 = vmatpush1.bf16.msra.mxu0 %v1536_v3  ;;  %391 = vmatpush1.bf16.msra.mxu1 %v1541_v4 }
  0x24   :  { %351 = vmatprep.subr.bf16.mxu0 %v1547_v5  ;;  %392 = vmatprep.subr.bf16.mxu1 %v1554_v6 }
  0x25   :  { %381 = vmatprep.mubr.bf16.mxu0 %v1498_v1  ;;  %422 = vmatprep.mubr.bf16.mxu1 %v1498_v1 }
  0x27   :  { %352 = vmatpush1.bf16.msra.mxu0 %v1559_v7  ;;  %393 = vmatpush1.bf16.msra.mxu1 %v1565_v8 }
  0x28   :  { %353 = vmatprep.subr.bf16.mxu0 %v1571_v9  ;;  %394 = vmatprep.subr.bf16.mxu1 %v1576_v10 }
  0x2b   :  { %354 = vmatpush1.bf16.msra.mxu0 %v1581_v11  ;;  %395 = vmatpush1.bf16.msra.mxu1 %v1586_v12 }
  0x2c   :  { %355 = vmatprep.subr.bf16.mxu0 %v1593_v13  ;;  %396 = vmatprep.subr.bf16.mxu1 %v1600_v14 }
  0x2f   :  { %356 = vmatpush1.bf16.msra.mxu0 %v1605_v15  ;;  %397 = vmatpush1.bf16.msra.mxu1 %v1612_v16 }
  0x30   :  { %357 = vmatprep.subr.bf16.mxu0 %v1617_v17  ;;  %398 = vmatprep.subr.bf16.mxu1 %v1624_v18 }
  0x33   :  { %358 = vmatpush1.bf16.msra.mxu0 %v1629_v19  ;;  %399 = vmatpush1.bf16.msra.mxu1 %v1634_v20 }
  0x34   :  { %359 = vmatprep.subr.bf16.mxu0 %v1641_v21  ;;  %400 = vmatprep.subr.bf16.mxu1 %v1648_v22 }
  0x37   :  { %360 = vmatpush1.bf16.msra.mxu0 %v1655_v23  ;;  %401 = vmatpush1.bf16.msra.mxu1 %v1660_v24 }
  0x38   :  { %361 = vmatprep.subr.bf16.mxu0 %v1667_v25  ;;  %402 = vmatprep.subr.bf16.mxu1 %v1672_v26 }
  0x3b   :  { %362 = vmatpush1.bf16.msra.mxu0 %v1679_v27  ;;  %403 = vmatpush1.bf16.msra.mxu1 %v1684_v28 }
  0x3c   :  { %363 = vmatprep.subr.bf16.mxu0 %v1691_v29  ;;  %404 = vmatprep.subr.bf16.mxu1 %v1696_v30 }
  0x3f   :  { %364 = vmatpush1.bf16.msra.mxu0 %v1703_v31  ;;  %405 = vmatpush1.bf16.msra.mxu1 %v1708_v32 }
  0x40   :  { %476 = vmatprep.subr.bf16.mxu0 %v1523_v0  ;;  %517 = vmatprep.subr.bf16.mxu1 %v1530_v2 }
  0xf5   :  { %v257_v37 = vpop.f32.mrb[0].mxu0  ;;  %v298_v38 = vpop.f32.mrb[0].mxu1 }
  0xf6   :  { %v305_v39 = vadd.f32 %v257_v37, %v58_v34  ;;  %v259_v41 = vpop.f32.mrb[1].mxu0  ;;  %v300_v42 = vpop.f32.mrb[1].mxu1  ;;  %v307_v49 = vadd.f32 %v298_v38, %v60_v40  ;;  %v1279_v40 = vld [vmem:[%s2218_s0 + $0x28] sm:$0xff] }
  0xf7   :  { %v306_v43 = vadd.f32 %v259_v41, %v59_v35  ;;  %v308_v44 = vadd.f32 %v300_v42, %v61_v36  ;;  %v261_v45 = vpop.f32.mrb[2].mxu0  ;;  %v302_v46 = vpop.f32.mrb[2].mxu1  ;;  %v1281_v41 = vld [vmem:[%s2218_s0 + $0x38] sm:$0xff] }
  0xf8   :  { %v262_v47 = vpop.f32.mrb[3].mxu0  ;;  %v303_v48 = vpop.f32.mrb[3].mxu1 }
  0xf9   :  { %v1762_v50 = vmax.f32 %v306_v43, %v305_v39  ;;  %v1277_v51 = vmul.f32 -1.442695, %v308_v44  ;;  %v1278_v44 = vld [vmem:[%s2218_s0 + $0x20] sm:$0xff] }
  0xfb   :  { %v318_v52 = vsub.f32 %v305_v39, %v1762_v50  ;;  %v321_v53 = vsub.f32 %v306_v43, %v1762_v50  ;;  %1370 = vpow2.f32 %v1277_v51 }
  0xfc   :  { %1372 = vtanh.f32 %v307_v49 }
  0xfd   :  { %v319_v54 = vmul.f32 1.442695, %v318_v52  ;;  %v322_v55 = vmul.f32 1.442695, %v321_v53 }
  0xff   :  { %1374 = vpow2.f32 %v319_v54 }
 0x100   :  { %1376 = vpow2.f32 %v322_v55  ;;  %v1280_v55 = vld [vmem:[%s2218_s0 + $0x30] sm:$0xff] }
 0x105   :  { %v1371_v56 = vpop.eup %1370 }
 0x106   :  { %v1373_v57 = vpop.eup %1372  ;;  %v313_v59 = vadd.f32 1.0, %v1371_v56 }
 0x108   :  { %1378 = vrcp.f32 %v313_v59 }
 0x109   :  { %v1375_v58 = vpop.eup %1374 }
 0x10a   :  { %v1377_v60 = vpop.eup %1376  ;;  %v325_v61 = vmul.f32 %v1375_v58, %v1373_v57 }
 0x10b   :  { %v324_v62 = vmul.f32 0.0, %v1377_v60 }
 0x10d   :  { %v1766_v63 = vadd.f32 %v325_v61, %v324_v62  ;;  %v1768_v33 = vadd.f32 %v1375_v58, %v324_v62 }
 0x10f   :  { %v330_v34 = vmax.f32 %v1768_v33, 1e-06 }
 0x111   :  { %1380 = vrcp.f32 %v330_v34 }
 0x112   :  { %v1379_v35 = vpop.eup %1378 }
 0x113   :  { %v329_v36 = vmul.f32 %v1379_v35, %v1766_v63 }
 0x11b   :  { %v1381_v37 = vpop.eup %1380 }
 0x11c   :  { %v332_v38 = vmul.f32 %v1381_v37, %v329_v36 }
 0x11e   :  { %333 = vst [vmem:[%s2219_s2] sm:$0xff] %v332_v38  ;;  %v348_v39 = vpack.c.bf16 %v332_v38, %v332_v38 }
 0x120   :  { %382 = vmatmul.mubr.bf16.vlgmr.msra.gmra.mrb[4].mxu0 %v348_v39  ;;  %423 = vmatmul.mubr.bf16.vlgmr.msra.gmra.mrb[4].mxu1 %v348_v39 }
 0x121   :  { %477 = vmatpush1.bf16.msra.mxu0 %v1536_v3  ;;  %518 = vmatpush1.bf16.msra.mxu1 %v1541_v4 }
 0x122   :  { %478 = vmatprep.subr.bf16.mxu0 %v1547_v5  ;;  %519 = vmatprep.subr.bf16.mxu1 %v1554_v6 }
 0x123   :  { %508 = vmatprep.mubr.bf16.mxu0 %v1498_v1  ;;  %549 = vmatprep.mubr.bf16.mxu1 %v1498_v1 }
 0x125   :  { %479 = vmatpush1.bf16.msra.mxu0 %v1559_v7  ;;  %520 = vmatpush1.bf16.msra.mxu1 %v1565_v8 }
 0x126   :  { %480 = vmatprep.subr.bf16.mxu0 %v1571_v9  ;;  %521 = vmatprep.subr.bf16.mxu1 %v1576_v10 }
 0x129   :  { %481 = vmatpush1.bf16.msra.mxu0 %v1581_v11  ;;  %522 = vmatpush1.bf16.msra.mxu1 %v1586_v12 }
 0x12a   :  { %482 = vmatprep.subr.bf16.mxu0 %v1593_v13  ;;  %523 = vmatprep.subr.bf16.mxu1 %v1600_v14 }
 0x12d   :  { %483 = vmatpush1.bf16.msra.mxu0 %v1605_v15  ;;  %524 = vmatpush1.bf16.msra.mxu1 %v1612_v16 }
 0x12e   :  { %484 = vmatprep.subr.bf16.mxu0 %v1617_v17  ;;  %525 = vmatprep.subr.bf16.mxu1 %v1624_v18 }
 0x131   :  { %485 = vmatpush1.bf16.msra.mxu0 %v1629_v19  ;;  %526 = vmatpush1.bf16.msra.mxu1 %v1634_v20 }
 0x132   :  { %486 = vmatprep.subr.bf16.mxu0 %v1641_v21  ;;  %527 = vmatprep.subr.bf16.mxu1 %v1648_v22 }
 0x135   :  { %487 = vmatpush1.bf16.msra.mxu0 %v1655_v23  ;;  %528 = vmatpush1.bf16.msra.mxu1 %v1660_v24 }
 0x136   :  { %488 = vmatprep.subr.bf16.mxu0 %v1667_v25  ;;  %529 = vmatprep.subr.bf16.mxu1 %v1672_v26 }
 0x139   :  { %489 = vmatpush1.bf16.msra.mxu0 %v1679_v27  ;;  %530 = vmatpush1.bf16.msra.mxu1 %v1684_v28 }
 0x13a   :  { %490 = vmatprep.subr.bf16.mxu0 %v1691_v29  ;;  %531 = vmatprep.subr.bf16.mxu1 %v1696_v30 }
 0x13d   :  { %491 = vmatpush1.bf16.msra.mxu0 %v1703_v31  ;;  %532 = vmatpush1.bf16.msra.mxu1 %v1708_v32 }
 0x13e   :  { %603 = vmatprep.subr.bf16.mxu0 %v1523_v0  ;;  %644 = vmatprep.subr.bf16.mxu1 %v1530_v2 }
 0x1f3   :  { %v383_v42 = vpop.f32.mrb[4].mxu0  ;;  %v424_v43 = vpop.f32.mrb[4].mxu1 }
 0x1f4   :  { %v385_v45 = vpop.f32.mrb[5].mxu0  ;;  %v426_v46 = vpop.f32.mrb[5].mxu1  ;;  %v431_v54 = vadd.f32 %v1278_v44, %v383_v42  ;;  %v433_v59 = vadd.f32 %v1280_v55, %v424_v43 }
 0x1f5   :  { %v432_v47 = vadd.f32 %v1279_v40, %v385_v45  ;;  %v434_v48 = vadd.f32 %v1281_v41, %v426_v46  ;;  %v387_v49 = vpop.f32.mrb[6].mxu0  ;;  %v428_v51 = vpop.f32.mrb[6].mxu1 }
 0x1f6   :  { %v388_v52 = vpop.f32.mrb[7].mxu0  ;;  %v429_v53 = vpop.f32.mrb[7].mxu1  ;;  %v1287_v49 = vld [vmem:[%s2218_s0 + $0x58] sm:$0xff] }
 0x1f7   :  { %v442_v56 = vadd.f32 %v432_v47, %v1762_v50  ;;  %v1282_v57 = vmul.f32 -1.442695, %v434_v48  ;;  %v1284_v53 = vld [vmem:[%s2218_s0 + $0x40] sm:$0xff] }
 0x1f9   :  { %v1822_v58 = vmax.f32 %v442_v56, %v431_v54  ;;  %1382 = vpow2.f32 %v1282_v57 }
 0x1fa   :  { %1384 = vtanh.f32 %v433_v59 }
 0x1fb   :  { %v444_v60 = vsub.f32 %v431_v54, %v1822_v58  ;;  %v447_v61 = vsub.f32 %v442_v56, %v1822_v58 }
 0x1fd   :  { %v445_v62 = vmul.f32 1.442695, %v444_v60  ;;  %v448_v34 = vmul.f32 1.442695, %v447_v61 }
 0x1ff   :  { %1386 = vpow2.f32 %v445_v62 }
 0x200   :  { %1388 = vpow2.f32 %v448_v34 }
 0x203   :  { %v1383_v35 = vpop.eup %1382 }
 0x204   :  { %v1385_v36 = vpop.eup %1384  ;;  %v439_v38 = vadd.f32 1.0, %v1383_v35  ;;  %v1286_v35 = vld [vmem:[%s2218_s0 + $0x50] sm:$0xff] }
 0x206   :  { %1390 = vrcp.f32 %v439_v38 }
 0x209   :  { %v1387_v37 = vpop.eup %1386 }
 0x20a   :  { %v1389_v39 = vpop.eup %1388  ;;  %v451_v50 = vmul.f32 %v1387_v37, %v1385_v36 }
 0x20b   :  { %v453_v40 = vmul.f32 %v1389_v39, %v1768_v33  ;;  %v450_v41 = vmul.f32 %v1389_v39, %v1766_v63  ;;  %v1285_v63 = vld [vmem:[%s2218_s0 + $0x48] sm:$0xff] }
 0x20d   :  { %v1828_v42 = vadd.f32 %v1387_v37, %v453_v40  ;;  %v1830_v43 = vadd.f32 %v451_v50, %v450_v41 }
 0x20f   :  { %v456_v44 = vmax.f32 %v1828_v42, 1e-06 }
 0x210   :  { %v1391_v45 = vpop.eup %1390 }
 0x211   :  { %1392 = vrcp.f32 %v456_v44  ;;  %v455_v46 = vmul.f32 %v1391_v45, %v1830_v43 }
 0x21b   :  { %v1393_v47 = vpop.eup %1392 }
 0x21c   :  { %v458_v48 = vmul.f32 %v1393_v47, %v455_v46 }
 0x21e   :  { %1283 = vst [vmem:[%s2219_s2 + $0x8] sm:$0xff] %v458_v48  ;;  %v475_v33 = vpack.c.bf16 %v458_v48, %v458_v48 }
 0x220   :  { %509 = vmatmul.mubr.bf16.vlgmr.msra.gmra.mrb[8].mxu0 %v475_v33  ;;  %550 = vmatmul.mubr.bf16.vlgmr.msra.gmra.mrb[8].mxu1 %v475_v33 }
 0x221   :  { %604 = vmatpush1.bf16.msra.mxu0 %v1536_v3  ;;  %645 = vmatpush1.bf16.msra.mxu1 %v1541_v4 }
 0x222   :  { %605 = vmatprep.subr.bf16.mxu0 %v1547_v5  ;;  %646 = vmatprep.subr.bf16.mxu1 %v1554_v6 }
 0x223   :  { %635 = vmatprep.mubr.bf16.mxu0 %v1498_v1  ;;  %676 = vmatprep.mubr.bf16.mxu1 %v1498_v1 }
 0x225   :  { %606 = vmatpush1.bf16.msra.mxu0 %v1559_v7  ;;  %647 = vmatpush1.bf16.msra.mxu1 %v1565_v8 }
 0x226   :  { %607 = vmatprep.subr.bf16.mxu0 %v1571_v9  ;;  %648 = vmatprep.subr.bf16.mxu1 %v1576_v10 }
 0x229   :  { %608 = vmatpush1.bf16.msra.mxu0 %v1581_v11  ;;  %649 = vmatpush1.bf16.msra.mxu1 %v1586_v12 }
 0x22a   :  { %609 = vmatprep.subr.bf16.mxu0 %v1593_v13  ;;  %650 = vmatprep.subr.bf16.mxu1 %v1600_v14 }
 0x22d   :  { %610 = vmatpush1.bf16.msra.mxu0 %v1605_v15  ;;  %651 = vmatpush1.bf16.msra.mxu1 %v1612_v16 }
 0x22e   :  { %611 = vmatprep.subr.bf16.mxu0 %v1617_v17  ;;  %652 = vmatprep.subr.bf16.mxu1 %v1624_v18 }
 0x231   :  { %612 = vmatpush1.bf16.msra.mxu0 %v1629_v19  ;;  %653 = vmatpush1.bf16.msra.mxu1 %v1634_v20 }
 0x232   :  { %613 = vmatprep.subr.bf16.mxu0 %v1641_v21  ;;  %654 = vmatprep.subr.bf16.mxu1 %v1648_v22 }
 0x235   :  { %614 = vmatpush1.bf16.msra.mxu0 %v1655_v23  ;;  %655 = vmatpush1.bf16.msra.mxu1 %v1660_v24 }
 0x236   :  { %615 = vmatprep.subr.bf16.mxu0 %v1667_v25  ;;  %656 = vmatprep.subr.bf16.mxu1 %v1672_v26 }
 0x239   :  { %616 = vmatpush1.bf16.msra.mxu0 %v1679_v27  ;;  %657 = vmatpush1.bf16.msra.mxu1 %v1684_v28 }
 0x23a   :  { %617 = vmatprep.subr.bf16.mxu0 %v1691_v29  ;;  %658 = vmatprep.subr.bf16.mxu1 %v1696_v30 }
 0x23d   :  { %618 = vmatpush1.bf16.msra.mxu0 %v1703_v31  ;;  %659 = vmatpush1.bf16.msra.mxu1 %v1708_v32 }
 0x23e   :  { %730 = vmatprep.subr.bf16.mxu0 %v1523_v0  ;;  %771 = vmatprep.subr.bf16.mxu1 %v1530_v2 }
 0x2f3   :  { %v510_v51 = vpop.f32.mrb[8].mxu0  ;;  %v551_v52 = vpop.f32.mrb[8].mxu1 }
 0x2f4   :  { %v512_v54 = vpop.f32.mrb[9].mxu0  ;;  %v553_v55 = vpop.f32.mrb[9].mxu1  ;;  %v558_v34 = vadd.f32 %v1284_v53, %v510_v51  ;;  %v560_v39 = vadd.f32 %v1286_v35, %v551_v52 }
 0x2f5   :  { %v559_v56 = vadd.f32 %v1285_v63, %v512_v54  ;;  %v561_v57 = vadd.f32 %v1287_v49, %v553_v55  ;;  %v514_v59 = vpop.f32.mrb[10].mxu0  ;;  %v555_v60 = vpop.f32.mrb[10].mxu1 }
 0x2f6   :  { %v515_v61 = vpop.f32.mrb[11].mxu0  ;;  %v556_v62 = vpop.f32.mrb[11].mxu1  ;;  %v1293_v59 = vld [vmem:[%s2218_s0 + $0x78] sm:$0xff] }
 0x2f7   :  { %v569_v36 = vadd.f32 %v559_v56, %v1822_v58  ;;  %v1288_v37 = vmul.f32 -1.442695, %v561_v57  ;;  %v1290_v62 = vld [vmem:[%s2218_s0 + $0x60] sm:$0xff] }
 0x2f9   :  { %v1884_v38 = vmax.f32 %v569_v36, %v558_v34  ;;  %1394 = vpow2.f32 %v1288_v37 }
 0x2fa   :  { %1396 = vtanh.f32 %v560_v39 }
 0x2fb   :  { %v571_v50 = vsub.f32 %v558_v34, %v1884_v38  ;;  %v574_v40 = vsub.f32 %v569_v36, %v1884_v38 }
 0x2fd   :  { %v572_v41 = vmul.f32 1.442695, %v571_v50  ;;  %v575_v44 = vmul.f32 1.442695, %v574_v40 }
 0x2ff   :  { %1398 = vpow2.f32 %v572_v41 }
 0x300   :  { %1400 = vpow2.f32 %v575_v44 }
 0x303   :  { %v1395_v45 = vpop.eup %1394 }
 0x304   :  { %v1397_v46 = vpop.eup %1396  ;;  %v566_v48 = vadd.f32 1.0, %v1395_v45  ;;  %v1292_v45 = vld [vmem:[%s2218_s0 + $0x70] sm:$0xff] }
 0x306   :  { %1402 = vrcp.f32 %v566_v48 }
 0x309   :  { %v1399_v47 = vpop.eup %1398 }
 0x30a   :  { %v1401_v33 = vpop.eup %1400  ;;  %v578_v58 = vmul.f32 %v1399_v47, %v1397_v46 }
 0x30b   :  { %v580_v63 = vmul.f32 %v1401_v33, %v1828_v42  ;;  %v577_v49 = vmul.f32 %v1401_v33, %v1830_v43  ;;  %v1291_v43 = vld [vmem:[%s2218_s0 + $0x68] sm:$0xff] }
 0x30d   :  { %v1890_v51 = vadd.f32 %v1399_v47, %v580_v63  ;;  %v1892_v52 = vadd.f32 %v578_v58, %v577_v49 }
 0x30f   :  { %v583_v53 = vmax.f32 %v1890_v51, 1e-06 }
 0x310   :  { %v1403_v54 = vpop.eup %1402 }
 0x311   :  { %1404 = vrcp.f32 %v583_v53  ;;  %v582_v55 = vmul.f32 %v1403_v54, %v1892_v52 }
 0x31b   :  { %v1405_v56 = vpop.eup %1404 }
 0x31c   :  { %v585_v57 = vmul.f32 %v1405_v56, %v582_v55 }
 0x31e   :  { %1289 = vst [vmem:[%s2219_s2 + $0x10] sm:$0xff] %v585_v57  ;;  %v602_v42 = vpack.c.bf16 %v585_v57, %v585_v57 }
 0x320   :  { %636 = vmatmul.mubr.bf16.vlgmr.msra.gmra.mrb[12].mxu0 %v602_v42  ;;  %677 = vmatmul.mubr.bf16.vlgmr.msra.gmra.mrb[12].mxu1 %v602_v42 }
 0x321   :  { %731 = vmatpush1.bf16.msra.mxu0 %v1536_v3  ;;  %772 = vmatpush1.bf16.msra.mxu1 %v1541_v4 }
 0x322   :  { %732 = vmatprep.subr.bf16.mxu0 %v1547_v5  ;;  %773 = vmatprep.subr.bf16.mxu1 %v1554_v6 }
 0x323   :  { %762 = vmatprep.mubr.bf16.mxu0 %v1498_v1  ;;  %803 = vmatprep.mubr.bf16.mxu1 %v1498_v1 }
 0x325   :  { %733 = vmatpush1.bf16.msra.mxu0 %v1559_v7  ;;  %774 = vmatpush1.bf16.msra.mxu1 %v1565_v8 }
 0x326   :  { %734 = vmatprep.subr.bf16.mxu0 %v1571_v9  ;;  %775 = vmatprep.subr.bf16.mxu1 %v1576_v10 }
 0x329   :  { %735 = vmatpush1.bf16.msra.mxu0 %v1581_v11  ;;  %776 = vmatpush1.bf16.msra.mxu1 %v1586_v12 }
 0x32a   :  { %736 = vmatprep.subr.bf16.mxu0 %v1593_v13  ;;  %777 = vmatprep.subr.bf16.mxu1 %v1600_v14 }
 0x32d   :  { %737 = vmatpush1.bf16.msra.mxu0 %v1605_v15  ;;  %778 = vmatpush1.bf16.msra.mxu1 %v1612_v16 }
 0x32e   :  { %738 = vmatprep.subr.bf16.mxu0 %v1617_v17  ;;  %779 = vmatprep.subr.bf16.mxu1 %v1624_v18 }
 0x331   :  { %739 = vmatpush1.bf16.msra.mxu0 %v1629_v19  ;;  %780 = vmatpush1.bf16.msra.mxu1 %v1634_v20 }
 0x332   :  { %740 = vmatprep.subr.bf16.mxu0 %v1641_v21  ;;  %781 = vmatprep.subr.bf16.mxu1 %v1648_v22 }
 0x335   :  { %741 = vmatpush1.bf16.msra.mxu0 %v1655_v23  ;;  %782 = vmatpush1.bf16.msra.mxu1 %v1660_v24 }
 0x336   :  { %742 = vmatprep.subr.bf16.mxu0 %v1667_v25  ;;  %783 = vmatprep.subr.bf16.mxu1 %v1672_v26 }
 0x339   :  { %743 = vmatpush1.bf16.msra.mxu0 %v1679_v27  ;;  %784 = vmatpush1.bf16.msra.mxu1 %v1684_v28 }
 0x33a   :  { %744 = vmatprep.subr.bf16.mxu0 %v1691_v29  ;;  %785 = vmatprep.subr.bf16.mxu1 %v1696_v30 }
 0x33d   :  { %745 = vmatpush1.bf16.msra.mxu0 %v1703_v31  ;;  %786 = vmatpush1.bf16.msra.mxu1 %v1708_v32 }
 0x33e   :  { %857 = vmatprep.subr.bf16.mxu0 %v1523_v0  ;;  %898 = vmatprep.subr.bf16.mxu1 %v1530_v2 }
 0x3f3   :  { %v637_v60 = vpop.f32.mrb[12].mxu0  ;;  %v678_v61 = vpop.f32.mrb[12].mxu1 }
 0x3f4   :  { %v639_v34 = vpop.f32.mrb[13].mxu0  ;;  %v680_v35 = vpop.f32.mrb[13].mxu1  ;;  %v685_v44 = vadd.f32 %v1290_v62, %v637_v60  ;;  %v687_v33 = vadd.f32 %v1292_v45, %v678_v61 }
 0x3f5   :  { %v686_v36 = vadd.f32 %v1291_v43, %v639_v34  ;;  %v688_v37 = vadd.f32 %v1293_v59, %v680_v35  ;;  %v641_v39 = vpop.f32.mrb[14].mxu0  ;;  %v682_v50 = vpop.f32.mrb[14].mxu1 }
 0x3f6   :  { %v642_v40 = vpop.f32.mrb[15].mxu0  ;;  %v683_v41 = vpop.f32.mrb[15].mxu1  ;;  %v1299_v39 = vld [vmem:[%s2218_s0 + $0x98] sm:$0xff] }
 0x3f7   :  { %v696_v46 = vadd.f32 %v686_v36, %v1884_v38  ;;  %v1294_v47 = vmul.f32 -1.442695, %v688_v37  ;;  %v1296_v41 = vld [vmem:[%s2218_s0 + $0x80] sm:$0xff] }
 0x3f9   :  { %v1946_v48 = vmax.f32 %v696_v46, %v685_v44  ;;  %1406 = vpow2.f32 %v1294_v47 }
 0x3fa   :  { %1408 = vtanh.f32 %v687_v33 }
 0x3fb   :  { %v698_v58 = vsub.f32 %v685_v44, %v1946_v48  ;;  %v701_v63 = vsub.f32 %v696_v46, %v1946_v48 }
 0x3fd   :  { %v699_v49 = vmul.f32 1.442695, %v698_v58  ;;  %v702_v53 = vmul.f32 1.442695, %v701_v63 }
 0x3ff   :  { %1410 = vpow2.f32 %v699_v49  ;;  %v1298_v49 = vld [vmem:[%s2218_s0 + $0x90] sm:$0xff] }
 0x400   :  { %1412 = vpow2.f32 %v702_v53 }
 0x403   :  { %v1407_v54 = vpop.eup %1406 }
 0x404   :  { %v1409_v55 = vpop.eup %1408  ;;  %v693_v57 = vadd.f32 1.0, %v1407_v54 }
 0x406   :  { %1414 = vrcp.f32 %v693_v57 }
 0x409   :  { %v1411_v56 = vpop.eup %1410 }
 0x40a   :  { %v1413_v42 = vpop.eup %1412  ;;  %v705_v38 = vmul.f32 %v1411_v56, %v1409_v55 }
 0x40b   :  { %v707_v43 = vmul.f32 %v1413_v42, %v1890_v51  ;;  %v704_v59 = vmul.f32 %v1413_v42, %v1892_v52  ;;  %v1297_v52 = vld [vmem:[%s2218_s0 + $0x88] sm:$0xff] }
 0x40d   :  { %v1952_v60 = vadd.f32 %v1411_v56, %v707_v43  ;;  %v1954_v61 = vadd.f32 %v705_v38, %v704_v59 }
 0x40f   :  { %v710_v62 = vmax.f32 %v1952_v60, 1e-06 }
 0x410   :  { %v1415_v34 = vpop.eup %1414 }
 0x411   :  { %1416 = vrcp.f32 %v710_v62  ;;  %v709_v35 = vmul.f32 %v1415_v34, %v1954_v61 }
 0x41b   :  { %v1417_v36 = vpop.eup %1416 }
 0x41c   :  { %v712_v37 = vmul.f32 %v1417_v36, %v709_v35 }
 0x41e   :  { %1295 = vst [vmem:[%s2219_s2 + $0x18] sm:$0xff] %v712_v37  ;;  %v729_v51 = vpack.c.bf16 %v712_v37, %v712_v37 }
 0x420   :  { %763 = vmatmul.mubr.bf16.vlgmr.msra.gmra.mrb[16].mxu0 %v729_v51  ;;  %804 = vmatmul.mubr.bf16.vlgmr.msra.gmra.mrb[16].mxu1 %v729_v51 }
 0x421   :  { %858 = vmatpush1.bf16.msra.mxu0 %v1536_v3  ;;  %899 = vmatpush1.bf16.msra.mxu1 %v1541_v4 }
 0x422   :  { %859 = vmatprep.subr.bf16.mxu0 %v1547_v5  ;;  %900 = vmatprep.subr.bf16.mxu1 %v1554_v6 }
 0x423   :  { %889 = vmatprep.mubr.bf16.mxu0 %v1498_v1  ;;  %930 = vmatprep.mubr.bf16.mxu1 %v1498_v1 }
 0x425   :  { %860 = vmatpush1.bf16.msra.mxu0 %v1559_v7  ;;  %901 = vmatpush1.bf16.msra.mxu1 %v1565_v8 }
 0x426   :  { %861 = vmatprep.subr.bf16.mxu0 %v1571_v9  ;;  %902 = vmatprep.subr.bf16.mxu1 %v1576_v10 }
 0x429   :  { %862 = vmatpush1.bf16.msra.mxu0 %v1581_v11  ;;  %903 = vmatpush1.bf16.msra.mxu1 %v1586_v12 }
 0x42a   :  { %863 = vmatprep.subr.bf16.mxu0 %v1593_v13  ;;  %904 = vmatprep.subr.bf16.mxu1 %v1600_v14 }
 0x42d   :  { %864 = vmatpush1.bf16.msra.mxu0 %v1605_v15  ;;  %905 = vmatpush1.bf16.msra.mxu1 %v1612_v16 }
 0x42e   :  { %865 = vmatprep.subr.bf16.mxu0 %v1617_v17  ;;  %906 = vmatprep.subr.bf16.mxu1 %v1624_v18 }
 0x431   :  { %866 = vmatpush1.bf16.msra.mxu0 %v1629_v19  ;;  %907 = vmatpush1.bf16.msra.mxu1 %v1634_v20 }
 0x432   :  { %867 = vmatprep.subr.bf16.mxu0 %v1641_v21  ;;  %908 = vmatprep.subr.bf16.mxu1 %v1648_v22 }
 0x435   :  { %868 = vmatpush1.bf16.msra.mxu0 %v1655_v23  ;;  %909 = vmatpush1.bf16.msra.mxu1 %v1660_v24 }
 0x436   :  { %869 = vmatprep.subr.bf16.mxu0 %v1667_v25  ;;  %910 = vmatprep.subr.bf16.mxu1 %v1672_v26 }
 0x439   :  { %870 = vmatpush1.bf16.msra.mxu0 %v1679_v27  ;;  %911 = vmatpush1.bf16.msra.mxu1 %v1684_v28 }
 0x43a   :  { %871 = vmatprep.subr.bf16.mxu0 %v1691_v29  ;;  %912 = vmatprep.subr.bf16.mxu1 %v1696_v30 }
 0x43d   :  { %872 = vmatpush1.bf16.msra.mxu0 %v1703_v31  ;;  %913 = vmatpush1.bf16.msra.mxu1 %v1708_v32 }
 0x43e   :  { %984 = vmatprep.subr.bf16.mxu0 %v1523_v0  ;;  %1025 = vmatprep.subr.bf16.mxu1 %v1530_v2 }
 0x4f3   :  { %v764_v50 = vpop.f32.mrb[16].mxu0  ;;  %v805_v40 = vpop.f32.mrb[16].mxu1 }
 0x4f4   :  { %v766_v44 = vpop.f32.mrb[17].mxu0  ;;  %v807_v45 = vpop.f32.mrb[17].mxu1  ;;  %v812_v63 = vadd.f32 %v1296_v41, %v764_v50  ;;  %v814_v56 = vadd.f32 %v1298_v49, %v805_v40 }
 0x4f5   :  { %v813_v46 = vadd.f32 %v1297_v52, %v766_v44  ;;  %v815_v0 = vadd.f32 %v1299_v39, %v807_v45  ;;  %v768_v47 = vpop.f32.mrb[18].mxu0  ;;  %v809_v2 = vpop.f32.mrb[18].mxu1 }
 0x4f6   :  { %v769_v33 = vpop.f32.mrb[19].mxu0  ;;  %v810_v58 = vpop.f32.mrb[19].mxu1 }
 0x4f7   :  { %v823_v53 = vadd.f32 %v813_v46, %v1946_v48  ;;  %v1300_v54 = vmul.f32 -1.442695, %v815_v0 }
 0x4f9   :  { %v2008_v55 = vmax.f32 %v823_v53, %v812_v63  ;;  %1418 = vpow2.f32 %v1300_v54 }
 0x4fa   :  { %1420 = vtanh.f32 %v814_v56  ;;  %v1469_v56 = vld [vmem:[%s2217_s1 + $0x8] ss:$16 sps:$4 sm:$0xff]  }
 0x4fb   :  { %v825_v57 = vsub.f32 %v812_v63, %v2008_v55  ;;  %v828_v42 = vsub.f32 %v823_v53, %v2008_v55 }
 0x4fd   :  { %v826_v38 = vmul.f32 1.442695, %v825_v57  ;;  %v829_v43 = vmul.f32 1.442695, %v828_v42  ;;  %v1470_v57 = vld [vmem:[%s2217_s1 + $0x24] ss:$16 sps:$4 sm:$0xff]  }
 0x4fe   :  { %v1471_v42 = vld [vmem:[%s2217_s1 + $0x2c] ss:$16 sps:$4 sm:$0xff]  }
 0x4ff   :  { %1422 = vpow2.f32 %v826_v38  ;;  %v1472_v38 = vld [vmem:[%s2217_s1 + $0x20] ss:$16 sps:$4 sm:$0xff]  }
 0x500   :  { %1424 = vpow2.f32 %v829_v43  ;;  %v1473_v43 = vld [vmem:[%s2217_s1 + $0x28] ss:$16 sps:$4 sm:$0xff]  }
 0x503   :  { %v1419_v59 = vpop.eup %1418 }
 0x504   :  { %v1421_v62 = vpop.eup %1420  ;;  %v820_v35 = vadd.f32 1.0, %v1419_v59  ;;  %v1474_v59 = vld [vmem:[%s2217_s1 + $0x44] ss:$16 sps:$4 sm:$0xff]  }
 0x506   :  { %1426 = vrcp.f32 %v820_v35  ;;  %v1478_v35 = vld [vmem:[%s2217_s1 + $0x64] ss:$16 sps:$4 sm:$0xff]  }
 0x509   :  { %v1423_v34 = vpop.eup %1422 }
 0x50a   :  { %v1425_v36 = vpop.eup %1424  ;;  %v832_v48 = vmul.f32 %v1423_v34, %v1421_v62  ;;  %v1475_v62 = vld [vmem:[%s2217_s1 + $0x4c] ss:$16 sps:$4 sm:$0xff]  }
 0x50b   :  { %v834_v37 = vmul.f32 %v1425_v36, %v1952_v60  ;;  %v831_v51 = vmul.f32 %v1425_v36, %v1954_v61  ;;  %v1479_v36 = vld [vmem:[%s2217_s1 + $0x6c] ss:$16 sps:$4 sm:$0xff]  }
 0x50d   :  { %v2014_v52 = vadd.f32 %v1423_v34, %v834_v37  ;;  %v2016_v39 = vadd.f32 %v832_v48, %v831_v51  ;;  %v1477_v34 = vld [vmem:[%s2217_s1 + $0x48] ss:$16 sps:$4 sm:$0xff]   ;;  %v1480_v48 = vld [vmem:[%s2217_s1 + $0x60] ss:$16 sps:$4 sm:$0xff]   ;;  %v1482_v51 = vld [vmem:[%s2217_s1 + $0x84] ss:$16 sps:$4 sm:$0xff]  }
 0x50e   :  { %v1481_v37 = vld [vmem:[%s2217_s1 + $0x68] ss:$16 sps:$4 sm:$0xff]  }
 0x50f   :  { %v837_v50 = vmax.f32 %v2014_v52, 1e-06 }
 0x510   :  { %v1427_v40 = vpop.eup %1426 }
 0x511   :  { %1428 = vrcp.f32 %v837_v50  ;;  %v836_v41 = vmul.f32 %v1427_v40, %v2016_v39  ;;  %v1485_v50 = vld [vmem:[%s2217_s1 + $0x88] ss:$16 sps:$4 sm:$0xff]   ;;  %v1486_v40 = vld [vmem:[%s2217_s1 + $0xa4] ss:$16 sps:$4 sm:$0xff]  }
 0x51b   :  { %v1429_v44 = vpop.eup %1428 }
 0x51c   :  { %v839_v45 = vmul.f32 %v1429_v44, %v836_v41  ;;  %v1487_v41 = vld [vmem:[%s2217_s1 + $0xac] ss:$16 sps:$4 sm:$0xff]   ;;  %v1488_v44 = vld [vmem:[%s2217_s1 + $0xa0] ss:$16 sps:$4 sm:$0xff]  }
 0x51e   :  { %1301 = vst [vmem:[%s2219_s2 + $0x20] sm:$0xff] %v839_v45  ;;  %v856_v60 = vpack.c.bf16 %v839_v45, %v839_v45  ;;  %v1489_v45 = vld [vmem:[%s2217_s1 + $0xa8] ss:$16 sps:$4 sm:$0xff]  }
 0x520   :  { %890 = vmatmul.mubr.bf16.vlgmr.msra.gmra.mrb[20].mxu0 %v856_v60  ;;  %931 = vmatmul.mubr.bf16.vlgmr.msra.gmra.mrb[20].mxu1 %v856_v60  ;;  %v1490_v60 = vld [vmem:[%s2217_s1 + $0xc4] ss:$16 sps:$4 sm:$0xff]  }
 0x521   :  { %985 = vmatpush1.bf16.msra.mxu0 %v1536_v3  ;;  %1026 = vmatpush1.bf16.msra.mxu1 %v1541_v4  ;;  %v1466_v3 = vld [vmem:[%s2217_s1 + $0x4] ss:$16 sps:$4 sm:$0xff]   ;;  %v1467_v4 = vld [vmem:[%s2217_s1 + $0xc] ss:$16 sps:$4 sm:$0xff]  }
 0x522   :  { %986 = vmatprep.subr.bf16.mxu0 %v1547_v5  ;;  %1027 = vmatprep.subr.bf16.mxu1 %v1554_v6  ;;  %v1303_v5 = vld [vmem:[%s2218_s0 + $0xa8] sm:$0xff]  ;;  %v1305_v6 = vld [vmem:[%s2218_s0 + $0xb8] sm:$0xff] }
 0x523   :  { %1016 = vmatprep.mubr.bf16.mxu0 %v1498_v1  ;;  %1057 = vmatprep.mubr.bf16.mxu1 %v1498_v1 }
 0x525   :  { %987 = vmatpush1.bf16.msra.mxu0 %v1559_v7  ;;  %1028 = vmatpush1.bf16.msra.mxu1 %v1565_v8 }
 0x526   :  { %988 = vmatprep.subr.bf16.mxu0 %v1571_v9  ;;  %1029 = vmatprep.subr.bf16.mxu1 %v1576_v10  ;;  %v1302_v9 = vld [vmem:[%s2218_s0 + $0xa0] sm:$0xff] }
 0x529   :  { %989 = vmatpush1.bf16.msra.mxu0 %v1581_v11  ;;  %1030 = vmatpush1.bf16.msra.mxu1 %v1586_v12 }
 0x52a   :  { %990 = vmatprep.subr.bf16.mxu0 %v1593_v13  ;;  %1031 = vmatprep.subr.bf16.mxu1 %v1600_v14 }
 0x52d   :  { %991 = vmatpush1.bf16.msra.mxu0 %v1605_v15  ;;  %1032 = vmatpush1.bf16.msra.mxu1 %v1612_v16 }
 0x52e   :  { %992 = vmatprep.subr.bf16.mxu0 %v1617_v17  ;;  %1033 = vmatprep.subr.bf16.mxu1 %v1624_v18 }
 0x531   :  { %993 = vmatpush1.bf16.msra.mxu0 %v1629_v19  ;;  %1034 = vmatpush1.bf16.msra.mxu1 %v1634_v20  ;;  %v1304_v19 = vld [vmem:[%s2218_s0 + $0xb0] sm:$0xff] }
 0x532   :  { %994 = vmatprep.subr.bf16.mxu0 %v1641_v21  ;;  %1035 = vmatprep.subr.bf16.mxu1 %v1648_v22 }
 0x535   :  { %995 = vmatpush1.bf16.msra.mxu0 %v1655_v23  ;;  %1036 = vmatpush1.bf16.msra.mxu1 %v1660_v24 }
 0x536   :  { %996 = vmatprep.subr.bf16.mxu0 %v1667_v25  ;;  %1037 = vmatprep.subr.bf16.mxu1 %v1672_v26 }
 0x539   :  { %997 = vmatpush1.bf16.msra.mxu0 %v1679_v27  ;;  %1038 = vmatpush1.bf16.msra.mxu1 %v1684_v28 }
 0x53a   :  { %998 = vmatprep.subr.bf16.mxu0 %v1691_v29  ;;  %1039 = vmatprep.subr.bf16.mxu1 %v1696_v30 }
 0x53d   :  { %999 = vmatpush1.bf16.msra.mxu0 %v1703_v31  ;;  %1040 = vmatpush1.bf16.msra.mxu1 %v1708_v32 }
 0x53e   :  { %1111 = vmatprep.subr.bf16.mxu0 %v1466_v3  ;;  %1152 = vmatprep.subr.bf16.mxu1 %v1467_v4  ;;  %v1491_v3 = vld [vmem:[%s2217_s1 + $0xcc] ss:$16 sps:$4 sm:$0xff]   ;;  %v1492_v4 = vld [vmem:[%s2217_s1 + $0xc0] ss:$16 sps:$4 sm:$0xff]  }
 0x5f3   :  { %v891_v7 = vpop.f32.mrb[20].mxu0  ;;  %v932_v8 = vpop.f32.mrb[20].mxu1 }
 0x5f4   :  { %v893_v10 = vpop.f32.mrb[21].mxu0  ;;  %v934_v11 = vpop.f32.mrb[21].mxu1  ;;  %v939_v18 = vadd.f32 %v1302_v9, %v891_v7  ;;  %v941_v23 = vadd.f32 %v1304_v19, %v932_v8  ;;  %v1495_v7 = vld [vmem:[%s2217_s1 + $0xec] ss:$16 sps:$4 sm:$0xff]   ;;  %v1496_v8 = vld [vmem:[%s2217_s1 + $0xe0] ss:$16 sps:$4 sm:$0xff]  }
 0x5f5   :  { %v940_v12 = vadd.f32 %v1303_v5, %v893_v10  ;;  %v942_v13 = vadd.f32 %v1305_v6, %v934_v11  ;;  %v895_v14 = vpop.f32.mrb[22].mxu0  ;;  %v936_v15 = vpop.f32.mrb[22].mxu1  ;;  %v1493_v5 = vld [vmem:[%s2217_s1 + $0xc8] ss:$16 sps:$4 sm:$0xff]   ;;  %v1494_v6 = vld [vmem:[%s2217_s1 + $0xe4] ss:$16 sps:$4 sm:$0xff]  }
 0x5f6   :  { %v896_v16 = vpop.f32.mrb[23].mxu0  ;;  %v937_v17 = vpop.f32.mrb[23].mxu1  ;;  %v1497_v9 = vld [vmem:[%s2217_s1 + $0xe8] ss:$16 sps:$4 sm:$0xff]   ;;  %v1308_v14 = vld [vmem:[%s2218_s0 + $0xc0] sm:$0xff] }
 0x5f7   :  { %v950_v20 = vadd.f32 %v940_v12, %v2008_v55  ;;  %v1306_v21 = vmul.f32 -1.442695, %v942_v13  ;;  %v1468_v55 = vld [vmem:[%s2217_s1] ss:$16 sps:$4 sm:$0xff]   ;;  %v1309_v10 = vld [vmem:[%s2218_s0 + $0xc8] sm:$0xff]  ;;  %v1311_v11 = vld [vmem:[%s2218_s0 + $0xd8] sm:$0xff] }
 0x5f9   :  { %v2074_v22 = vmax.f32 %v950_v20, %v939_v18  ;;  %1430 = vpow2.f32 %v1306_v21 }
 0x5fa   :  { %1432 = vtanh.f32 %v941_v23 }
 0x5fb   :  { %v952_v24 = vsub.f32 %v939_v18, %v2074_v22  ;;  %v955_v25 = vsub.f32 %v950_v20, %v2074_v22 }
 0x5fd   :  { %v953_v26 = vmul.f32 1.442695, %v952_v24  ;;  %v956_v27 = vmul.f32 1.442695, %v955_v25  ;;  %v1310_v25 = vld [vmem:[%s2218_s0 + $0xd0] sm:$0xff] }
 0x5ff   :  { %1434 = vpow2.f32 %v953_v26 }
 0x600   :  { %1436 = vpow2.f32 %v956_v27 }
 0x603   :  { %v1431_v28 = vpop.eup %1430 }
 0x604   :  { %v1433_v29 = vpop.eup %1432  ;;  %v947_v31 = vadd.f32 1.0, %v1431_v28 }
 0x606   :  { %1438 = vrcp.f32 %v947_v31 }
 0x609   :  { %v1435_v30 = vpop.eup %1434 }
 0x60a   :  { %v1437_v32 = vpop.eup %1436  ;;  %v959_v61 = vmul.f32 %v1435_v30, %v1433_v29 }
 0x60b   :  { %v961_v46 = vmul.f32 %v1437_v32, %v2014_v52  ;;  %v958_v0 = vmul.f32 %v1437_v32, %v2016_v39  ;;  %v1483_v52 = vld [vmem:[%s2217_s1 + $0x8c] ss:$16 sps:$4 sm:$0xff]   ;;  %v1484_v39 = vld [vmem:[%s2217_s1 + $0x80] ss:$16 sps:$4 sm:$0xff]  }
 0x60d   :  { %v2080_v47 = vadd.f32 %v1435_v30, %v961_v46  ;;  %v2082_v2 = vadd.f32 %v959_v61, %v958_v0 }
 0x60f   :  { %v964_v33 = vmax.f32 %v2080_v47, 1e-06 }
 0x610   :  { %v1439_v58 = vpop.eup %1438 }
 0x611   :  { %1440 = vrcp.f32 %v964_v33  ;;  %v963_v63 = vmul.f32 %v1439_v58, %v2082_v2 }
 0x61b   :  { %v1441_v49 = vpop.eup %1440 }
 0x61c   :  { %v966_v53 = vmul.f32 %v1441_v49, %v963_v63 }
 0x61e   :  { %1307 = vst [vmem:[%s2219_s2 + $0x28] sm:$0xff] %v966_v53  ;;  %v983_v54 = vpack.c.bf16 %v966_v53, %v966_v53 }
 0x620   :  { %1017 = vmatmul.mubr.bf16.vlgmr.msra.gmra.mrb[24].mxu0 %v983_v54  ;;  %1058 = vmatmul.mubr.bf16.vlgmr.msra.gmra.mrb[24].mxu1 %v983_v54 }
 0x621   :  { %1112 = vmatpush1.bf16.msra.mxu0 %v1468_v55  ;;  %1153 = vmatpush1.bf16.msra.mxu1 %v1469_v56 }
 0x622   :  { %1113 = vmatprep.subr.bf16.mxu0 %v1470_v57  ;;  %1154 = vmatprep.subr.bf16.mxu1 %v1471_v42 }
 0x623   :  { %1143 = vmatprep.mubr.bf16.mxu0 %v1498_v1  ;;  %1184 = vmatprep.mubr.bf16.mxu1 %v1498_v1  ;;  %v1476_v1 = vld [vmem:[%s2217_s1 + $0x40] ss:$16 sps:$4 sm:$0xff]  }
 0x625   :  { %1114 = vmatpush1.bf16.msra.mxu0 %v1472_v38  ;;  %1155 = vmatpush1.bf16.msra.mxu1 %v1473_v43 }
 0x626   :  { %1115 = vmatprep.subr.bf16.mxu0 %v1474_v59  ;;  %1156 = vmatprep.subr.bf16.mxu1 %v1475_v62 }
 0x629   :  { %1116 = vmatpush1.bf16.msra.mxu0 %v1476_v1  ;;  %1157 = vmatpush1.bf16.msra.mxu1 %v1477_v34  ;;  %v1314_v34 = vld [vmem:[%s2218_s0 + $0xe0] sm:$0xff] }
 0x62a   :  { %1117 = vmatprep.subr.bf16.mxu0 %v1478_v35  ;;  %1158 = vmatprep.subr.bf16.mxu1 %v1479_v36 }
 0x62d   :  { %1118 = vmatpush1.bf16.msra.mxu0 %v1480_v48  ;;  %1159 = vmatpush1.bf16.msra.mxu1 %v1481_v37 }
 0x62e   :  { %1119 = vmatprep.subr.bf16.mxu0 %v1482_v51  ;;  %1160 = vmatprep.subr.bf16.mxu1 %v1483_v52 }
 0x631   :  { %1120 = vmatpush1.bf16.msra.mxu0 %v1484_v39  ;;  %1161 = vmatpush1.bf16.msra.mxu1 %v1485_v50 }
 0x632   :  { %1121 = vmatprep.subr.bf16.mxu0 %v1486_v40  ;;  %1162 = vmatprep.subr.bf16.mxu1 %v1487_v41  ;;  %v1316_v41 = vld [vmem:[%s2218_s0 + $0xf0] sm:$0xff] }
 0x635   :  { %1122 = vmatpush1.bf16.msra.mxu0 %v1488_v44  ;;  %1163 = vmatpush1.bf16.msra.mxu1 %v1489_v45 }
 0x636   :  { %1123 = vmatprep.subr.bf16.mxu0 %v1490_v60  ;;  %1164 = vmatprep.subr.bf16.mxu1 %v1491_v3 }
 0x639   :  { %1124 = vmatpush1.bf16.msra.mxu0 %v1492_v4  ;;  %1165 = vmatpush1.bf16.msra.mxu1 %v1493_v5 }
 0x63a   :  { %1125 = vmatprep.subr.bf16.mxu0 %v1494_v6  ;;  %1166 = vmatprep.subr.bf16.mxu1 %v1495_v7 }
 0x63d   :  { %1126 = vmatpush1.bf16.msra.mxu0 %v1496_v8  ;;  %1167 = vmatpush1.bf16.msra.mxu1 %v1497_v9 }
 0x6f3   :  { %v1018_v12 = vpop.f32.mrb[24].mxu0  ;;  %v1059_v13 = vpop.f32.mrb[24].mxu1 }
 0x6f4   :  { %v1020_v15 = vpop.f32.mrb[25].mxu0  ;;  %v1061_v16 = vpop.f32.mrb[25].mxu1  ;;  %v1066_v24 = vadd.f32 %v1308_v14, %v1018_v12  ;;  %v1068_v29 = vadd.f32 %v1310_v25, %v1059_v13 }
 0x6f5   :  { %v1067_v17 = vadd.f32 %v1309_v10, %v1020_v15  ;;  %v1069_v18 = vadd.f32 %v1311_v11, %v1061_v16  ;;  %v1022_v19 = vpop.f32.mrb[26].mxu0  ;;  %v1063_v20 = vpop.f32.mrb[26].mxu1 }
 0x6f6   :  { %v1023_v21 = vpop.f32.mrb[27].mxu0  ;;  %v1064_v23 = vpop.f32.mrb[27].mxu1 }
 0x6f7   :  { %v1077_v26 = vadd.f32 %v1067_v17, %v2074_v22  ;;  %v1312_v27 = vmul.f32 -1.442695, %v1069_v18 }
 0x6f9   :  { %v1078_v28 = vmax.f32 %v1077_v26, %v1066_v24  ;;  %1442 = vpow2.f32 %v1312_v27 }
 0x6fa   :  { %1444 = vtanh.f32 %v1068_v29 }
 0x6fb   :  { %v1079_v30 = vsub.f32 %v1066_v24, %v1078_v28  ;;  %v1082_v31 = vsub.f32 %v1077_v26, %v1078_v28 }
 0x6fd   :  { %v1080_v32 = vmul.f32 1.442695, %v1079_v30  ;;  %v1083_v61 = vmul.f32 1.442695, %v1082_v31 }
 0x6ff   :  { %1446 = vpow2.f32 %v1080_v32 }
 0x700   :  { %1448 = vpow2.f32 %v1083_v61 }
 0x703   :  { %v1443_v46 = vpop.eup %1442 }
 0x704   :  { %v1445_v0 = vpop.eup %1444  ;;  %v1074_v58 = vadd.f32 1.0, %v1443_v46 }
 0x706   :  { %1450 = vrcp.f32 %v1074_v58 }
 0x709   :  { %v1447_v33 = vpop.eup %1446 }
 0x70a   :  { %v1449_v63 = vpop.eup %1448  ;;  %v1086_v49 = vmul.f32 %v1447_v33, %v1445_v0 }
 0x70b   :  { %v1088_v53 = vmul.f32 %v1449_v63, %v2080_v47  ;;  %v1085_v22 = vmul.f32 %v1449_v63, %v2082_v2  ;;  %v1315_v47 = vld [vmem:[%s2218_s0 + $0xe8] sm:$0xff]  ;;  %v1317_v2 = vld [vmem:[%s2218_s0 + $0xf8] sm:$0xff] }
 0x70d   :  { %v1089_v54 = vadd.f32 %v1447_v33, %v1088_v53  ;;  %v1087_v55 = vadd.f32 %v1086_v49, %v1085_v22 }
 0x70f   :  { %v1091_v56 = vmax.f32 %v1089_v54, 1e-06 }
 0x710   :  { %v1451_v57 = vpop.eup %1450 }
 0x711   :  { %1452 = vrcp.f32 %v1091_v56  ;;  %v1090_v42 = vmul.f32 %v1451_v57, %v1087_v55 }
 0x71b   :  { %v1453_v38 = vpop.eup %1452 }
 0x71c   :  { %v1093_v43 = vmul.f32 %v1453_v38, %v1090_v42 }
 0x71e   :  { %1313 = vst [vmem:[%s2219_s2 + $0x30] sm:$0xff] %v1093_v43  ;;  %v1110_v59 = vpack.c.bf16 %v1093_v43, %v1093_v43 }
 0x720   :  { %1144 = vmatmul.mubr.bf16.vlgmr.msra.gmra.mrb[28].mxu0 %v1110_v59  ;;  %1185 = vmatmul.mubr.bf16.vlgmr.msra.gmra.mrb[28].mxu1 %v1110_v59 }
 0x7f3   :  { %v1145_v62 = vpop.f32.mrb[28].mxu0  ;;  %v1186_v1 = vpop.f32.mrb[28].mxu1 }
 0x7f4   :  { %v1147_v35 = vpop.f32.mrb[29].mxu0  ;;  %v1188_v36 = vpop.f32.mrb[29].mxu1  ;;  %v1193_v40 = vadd.f32 %v1314_v34, %v1145_v62  ;;  %v1195_v3 = vadd.f32 %v1316_v41, %v1186_v1 }
 0x7f5   :  { %v1194_v48 = vadd.f32 %v1315_v47, %v1147_v35  ;;  %v1196_v37 = vadd.f32 %v1317_v2, %v1188_v36  ;;  %v1149_v51 = vpop.f32.mrb[30].mxu0  ;;  %v1190_v52 = vpop.f32.mrb[30].mxu1 }
 0x7f6   :  { %v1150_v39 = vpop.f32.mrb[31].mxu0  ;;  %v1191_v50 = vpop.f32.mrb[31].mxu1 }
 0x7f7   :  { %v1204_v44 = vadd.f32 %v1194_v48, %v1078_v28  ;;  %v1318_v45 = vmul.f32 -1.442695, %v1196_v37 }
 0x7f9   :  { %v1205_v60 = vmax.f32 %v1204_v44, %v1193_v40  ;;  %1454 = vpow2.f32 %v1318_v45 }
 0x7fa   :  { %1456 = vtanh.f32 %v1195_v3 }
 0x7fb   :  { %v1206_v4 = vsub.f32 %v1193_v40, %v1205_v60  ;;  %v1209_v5 = vsub.f32 %v1204_v44, %v1205_v60 }
 0x7fd   :  { %v1207_v6 = vmul.f32 1.442695, %v1206_v4  ;;  %v1210_v7 = vmul.f32 1.442695, %v1209_v5 }
 0x7ff   :  { %1458 = vpow2.f32 %v1207_v6 }
 0x800   :  { %1460 = vpow2.f32 %v1210_v7 }
 0x803   :  { %v1455_v8 = vpop.eup %1454 }
 0x804   :  { %v1201_v9 = vadd.f32 1.0, %v1455_v8  ;;  %v1457_v10 = vpop.eup %1456 }
 0x806   :  { %1462 = vrcp.f32 %v1201_v9 }
 0x809   :  { %v1459_v11 = vpop.eup %1458 }
 0x80a   :  { %v1461_v12 = vpop.eup %1460  ;;  %v1213_v13 = vmul.f32 %v1459_v11, %v1457_v10 }
 0x80b   :  { %v1212_v14 = vmul.f32 %v1461_v12, %v1087_v55  ;;  %v1215_v15 = vmul.f32 %v1461_v12, %v1089_v54 }
 0x80d   :  { %v1216_v16 = vadd.f32 %v1459_v11, %v1215_v15  ;;  %v1214_v17 = vadd.f32 %v1213_v13, %v1212_v14 }
 0x80f   :  { %v1218_v18 = vmax.f32 %v1216_v16, 1e-06  ;;  %1236 = vst [vmem:[%s2220_s3] sm:$0xff] %v1214_v17 }
 0x810   :  { %v1463_v19 = vpop.eup %1462 }
 0x811   :  { %1464 = vrcp.f32 %v1218_v18  ;;  %v1217_v20 = vmul.f32 %v1463_v19, %v1214_v17 }
 0x81b   :  { %v1465_v21 = vpop.eup %1464 }
 0x81c   :  { %v1220_v23 = vmul.f32 %v1465_v21, %v1217_v20 }
 0x81e   :  { %1319 = vst [vmem:[%s2219_s2 + $0x38] sm:$0xff] %v1220_v23 }

</bundles_post_ra>
